<compile_context>
chip_gen: v5e
topology: v5e:2x2
jax: 0.10.0
libtpu: 0.0.40
codegen_flags: <defaults>
</compile_context>

<pallas_src>
import math
import functools

import jax
import jax.numpy as jnp
from jax.experimental import pallas as pl
from jax.experimental.pallas import tpu as pltpu


def _round_up(x, m):
    return (x + m - 1) // m * m


# ---------------------------------------------------------------------------
# Pallas kernel: transposed fused matmul
#   out (Cout_pad, M) = [relu]( W (Cout_pad, K) @ A (K, M) + shift (Cout_pad,1) )
# bf16 MXU operands, f32 accumulate, f32 epilogue, cast on store.
# ---------------------------------------------------------------------------
def _fused_matmul_t_kernel(w_ref, a_ref, s_ref, o_ref, *, relu):
    acc = jnp.dot(w_ref[...], a_ref[...], preferred_element_type=jnp.float32)
    out = acc + s_ref[...]
    if relu:
        out = jnp.maximum(out, 0.0)
    o_ref[...] = out.astype(o_ref.dtype)


def fused_matmul_t(wmat, a, shift, *, relu, out_dtype=jnp.bfloat16):
    """out = [relu](wmat @ a + shift[:, None]); wmat:(cout,K) a:(K,M) shift:(cout,)."""
    cout, K = wmat.shape
    K2, M = a.shape
    assert K == K2
    co_p = _round_up(cout, 8)
    Kp = _round_up(K, 8)
    # Lane tiling: one full-extent tile for small layers; 1024-lane tiles for
    # the big (M=8192) layers -> 8 parallel tiles for v7x's 2 TensorCores.
    tm = _round_up(M, 128) if M <= 2048 else 1024
    Mp = _round_up(M, tm)

    w_p = jnp.pad(wmat, ((0, co_p - cout), (0, Kp - K))).astype(jnp.bfloat16)
    a_p = a.astype(jnp.bfloat16)
    if Kp != K or Mp != M:
        a_p = jnp.pad(a_p, ((0, Kp - K), (0, Mp - M)))
    s_p = jnp.pad(shift.astype(jnp.float32).reshape(cout, 1),
                  ((0, co_p - cout), (0, 0)))

    out = pl.pallas_call(
        functools.partial(_fused_matmul_t_kernel, relu=relu),
        out_shape=jax.ShapeDtypeStruct((co_p, Mp), out_dtype),
        grid_spec=pltpu.PrefetchScalarGridSpec(
            num_scalar_prefetch=0,
            grid=(Mp // tm,),
            in_specs=[
                pl.BlockSpec((co_p, Kp), lambda i: (0, 0)),   # resident weights
                pl.BlockSpec((Kp, tm), lambda i: (0, i)),     # streamed A tiles
                pl.BlockSpec((co_p, 1), lambda i: (0, 0)),    # resident shift
            ],
            out_specs=pl.BlockSpec((co_p, tm), lambda i: (0, i)),
        ),
        compiler_params=pltpu.CompilerParams(
            dimension_semantics=("parallel",)),
    )(w_p, a_p, s_p)
    if co_p != cout or Mp != M:
        out = out[:cout, :M]
    return out


# ---------------------------------------------------------------------------
# JAX glue in channel-major bf16 layout: activations are (C, N, H, W) bf16.
# ---------------------------------------------------------------------------
def _to_internal(x):
    """NCHW f32 -> channel-major (C, N, H, W) bf16 (boundary conversion only)."""
    return jnp.transpose(x, (1, 0, 2, 3)).astype(jnp.bfloat16)


def conv3x3_bn_relu_cm(parts, w, b, gamma, beta, mean, var, eps=1e-5):
    """3x3 conv (pad=1) + eval-mode BN + ReLU on the channel-concat of `parts`.

    parts: list of channel-major (Ci, N, H, W) bf16 tensors; the stage concat
    is folded into the bf16 patch construction (no concatenated tensor built).
    w: (Cout, sum(Ci), 3, 3).  Returns (Cout, N, H, W) bf16.
    """
    n, h, wd = parts[0].shape[1:]
    cout, cin = w.shape[0], w.shape[1]
    m = n * h * wd
    padded = [jnp.pad(p, ((0, 0), (0, 0), (1, 1), (1, 1))) for p in parts]
    rows = []
    for di in range(3):
        for dj in range(3):
            for p in padded:
                rows.append(p[:, :, di:di + h, dj:dj + wd].reshape(p.shape[0], m))
    a = jnp.concatenate(rows, axis=0)                      # (9*cin, M) bf16
    bn_scale = gamma / jnp.sqrt(var + eps)
    # fold BN scale into the weight rows; conv bias + BN shift into `shift`
    wmat = jnp.transpose(w, (0, 2, 3, 1)).reshape(cout, 9 * cin) * bn_scale[:, None]
    shift = (b - mean) * bn_scale + beta
    out = fused_matmul_t(wmat, a, shift, relu=True, out_dtype=jnp.bfloat16)
    return out.reshape(cout, n, h, wd)


def conv_transpose_cm(x_cm, tw, tb, k):
    """ConvTranspose2d(cin->cout, kernel=stride=k, pad=0), channel-major."""
    cin, n, h, wd = x_cm.shape
    cout = tw.shape[1]
    a = x_cm.reshape(cin, n * h * wd)
    wmat = jnp.transpose(tw, (1, 2, 3, 0)).reshape(cout * k * k, cin)
    shift = jnp.repeat(tb, k * k)
    out = fused_matmul_t(wmat, a, shift, relu=False, out_dtype=jnp.bfloat16)
    out = out.reshape(cout, k, k, n, h, wd)
    # (co,kh,kw,n,h,w) -> (co,n,h,kh,w,kw) -> (co,n,H*k,W*k).
    # TODO(synk): could be emitted directly via out_spec index maps, but the
    # tensor is tiny (<=64 KiB) so one small XLA copy is acceptable.
    return jnp.transpose(out, (0, 3, 4, 1, 5, 2)).reshape(cout, n, h * k, wd * k)


def conv1x1_cm(x_cm, w, b):
    cin, n, h, wd = x_cm.shape
    cout = w.shape[0]
    a = x_cm.reshape(cin, n * h * wd)
    wmat = w.reshape(cout, cin)
    out = fused_matmul_t(wmat, a, b, relu=False, out_dtype=jnp.float32)
    return out.reshape(cout, n, h, wd)


# ---------------------------------------------------------------------------
# decoder_unet structure (mirrors the PyTorch __init__ channel bookkeeping)
# ---------------------------------------------------------------------------
def _normal(key, shape, scale=0.1):
    return scale * jax.random.normal(key, shape, dtype=jnp.float32)


def decoder_stages(init_features, res):
    if res == 64 or res == 256:
        out_ch = 2 ** (int(math.log(res // 2, 4)) + 1) * init_features
    else:
        out_ch = 2 ** int(math.log(res // 2, 4)) * init_features
    in_ch = out_ch // 2
    stages = []
    if res == 64 or res == 256:
        stages.append((2, out_ch, in_ch))          # Up  (x2 upsample)
        out_ch, in_ch = in_ch, in_ch // 2
    for _ in range(int(math.log(res // 2, 4))):
        stages.append((4, out_ch, in_ch))          # Upi (x4 upsample)
        out_ch, in_ch = in_ch, in_ch // 2
    return stages


def init_decoder(n_classes, init_features, res, key):
    stages = decoder_stages(init_features, res)
    params, factors = [], []
    for si, (factor, cin, cout) in enumerate(stages):
        ks = jax.random.split(jax.random.fold_in(key, si), 6)
        factors.append(factor)
        params.append(dict(
            tw=_normal(ks[0], (cin, cin // 2, factor, factor)),
            tb=_normal(ks[1], (cin // 2,)),
            w1=_normal(ks[2], (cout, cin, 3, 3)), b1=_normal(ks[3], (cout,)),
            w2=_normal(ks[4], (cout, cout, 3, 3)), b2=_normal(ks[5], (cout,)),
            g1=jnp.ones((cout,)), be1=jnp.zeros((cout,)),
            m1=jnp.zeros((cout,)), v1=jnp.ones((cout,)),
            g2=jnp.ones((cout,)), be2=jnp.zeros((cout,)),
            m2=jnp.zeros((cout,)), v2=jnp.ones((cout,)),
        ))
    k1, k2 = jax.random.split(jax.random.fold_in(key, 1000))
    out_params = dict(w=_normal(k1, (n_classes, init_features, 1, 1)),
                      b=_normal(k2, (n_classes,)))
    return params, out_params, tuple(factors)


def decoder_unet_forward(x, resi, params, out_params, factors):
    x_cm = _to_internal(x)
    for i, (p, factor) in enumerate(zip(params, factors)):
        skip_cm = _to_internal(resi[len(resi) - i - 1])
        up_cm = conv_transpose_cm(x_cm, p["tw"], p["tb"], factor)
        # torch.cat([skip, up], dim=1) is folded into the conv1 patch build.
        y = conv3x3_bn_relu_cm([skip_cm, up_cm], p["w1"], p["b1"],
                               p["g1"], p["be1"], p["m1"], p["v1"])
        x_cm = conv3x3_bn_relu_cm([y], p["w2"], p["b2"],
                                  p["g2"], p["be2"], p["m2"], p["v2"])
    out_cm = conv1x1_cm(x_cm, out_params["w"], out_params["b"])  # (ncls,N,H,W) f32
    return jnp.transpose(out_cm, (1, 0, 2, 3))                   # -> NCHW


if __name__ == "__main__":
    n_classes, init_features, res, batch = 3, 4, 64, 2
    key = jax.random.PRNGKey(0)
    params, out_params, factors = init_decoder(
        n_classes, init_features, res, jax.random.fold_in(key, 1))

    # bottleneck x: (B, 8f, 2, 2); skips resi: [(B,f,64,64), (B,2f,16,16), (B,4f,4,4)]
    kx, k0, k1, k2 = jax.random.split(jax.random.fold_in(key, 2), 4)
    x = jax.random.normal(kx, (batch, 8 * init_features, 2, 2), jnp.float32)
    resi = [
        jax.random.normal(k0, (batch, init_features, 64, 64), jnp.float32),
        jax.random.normal(k1, (batch, 2 * init_features, 16, 16), jnp.float32),
        jax.random.normal(k2, (batch, 4 * init_features, 4, 4), jnp.float32),
    ]

    fwd = jax.jit(decoder_unet_forward, static_argnames=("factors",))
    logits = fwd(x, resi, params, out_params, factors=factors)
    logits = jax.block_until_ready(logits)
    assert logits.shape == (batch, n_classes, res, res), logits.shape
    assert bool(jnp.all(jnp.isfinite(logits)))
    print("KERNEL_OK")
</pallas_src>

<mosaic_0001>
module attributes {stable_mosaic.version = 11 : i64} {
  func.func @_fused_matmul_t_kernel(%arg0: i32, %arg1: memref<64x32xbf16, #tpu.memory_space<vmem>>, %arg2: memref<32x128xbf16, #tpu.memory_space<vmem>>, %arg3: memref<64x1xf32, #tpu.memory_space<vmem>>, %arg4: memref<64x128xbf16, #tpu.memory_space<vmem>>) attributes {dimension_semantics = [#tpu.dimension_semantics<parallel>], iteration_bounds = array<i64: 1>, scalar_prefetch = 0 : i64, scratch_operands = 0 : i64, tpu.core_type = #tpu.core_type<tc>, window_params = [{pipeline_mode = #tpu.pipeline_mode<synchronous>, transform_indices = @transform_0, window_bounds = array<i64: 64, 32>}, {transform_indices = @transform_1, window_bounds = array<i64: 32, 128>}, {pipeline_mode = #tpu.pipeline_mode<synchronous>, transform_indices = @transform_2, window_bounds = array<i64: 64, 1>}, {transform_indices = @transform_3, window_bounds = array<i64: 64, 128>}]} {
    %c0 = arith.constant 0 : index
    %c0_0 = arith.constant 0 : index
    %0 = vector.load %arg1[%c0, %c0_0] : memref<64x32xbf16, #tpu.memory_space<vmem>>, vector<64x32xbf16>
    %c0_1 = arith.constant 0 : index
    %c0_2 = arith.constant 0 : index
    %1 = vector.load %arg2[%c0_1, %c0_2] : memref<32x128xbf16, #tpu.memory_space<vmem>>, vector<32x128xbf16>
    %cst = arith.constant dense<0.000000e+00> : vector<64x128xf32>
    %2 = tpu.matmul %0, %1, %cst {dimension_numbers = #tpu.dot_dimension_numbers<[1], [0], [0], [1], [0, 0, 1, 1], [], []>} : vector<64x32xbf16>, vector<32x128xbf16>, vector<64x128xf32> -> vector<64x128xf32>
    %c0_3 = arith.constant 0 : index
    %c0_4 = arith.constant 0 : index
    %3 = vector.load %arg3[%c0_3, %c0_4] : memref<64x1xf32, #tpu.memory_space<vmem>>, vector<64x1xf32>
    %4 = vector.broadcast %3 : vector<64x1xf32> to vector<64x128xf32>
    %5 = arith.addf %2, %4 : vector<64x128xf32>
    %6 = arith.truncf %5 : vector<64x128xf32> to vector<64x128xbf16>
    %c0_5 = arith.constant 0 : index
    %c0_6 = arith.constant 0 : index
    %7 = vector.load %arg4[%c0_5, %c0_6] : memref<64x128xbf16, #tpu.memory_space<vmem>>, vector<64x128xbf16>
    tpu.vector_store %arg4[%c0_5, %c0_6], %6 {strides = array<i32>} : memref<64x128xbf16, #tpu.memory_space<vmem>>, vector<64x128xbf16>,
    return
  }
  func.func @transform_0(%arg0: i32) -> (i32, i32) {
    %c0_i32 = arith.constant 0 : i32
    %c0_i32_0 = arith.constant 0 : i32
    %c0_i32_1 = arith.constant 0 : i32
    return %c0_i32, %c0_i32_0 : i32, i32
  }
  func.func @transform_1(%arg0: i32) -> (i32, i32) {
    %c0_i32 = arith.constant 0 : i32
    %c0_i32_0 = arith.constant 0 : i32
    return %c0_i32, %arg0 : i32, i32
  }
  func.func @transform_2(%arg0: i32) -> (i32, i32) {
    %c0_i32 = arith.constant 0 : i32
    %c0_i32_0 = arith.constant 0 : i32
    %c0_i32_1 = arith.constant 0 : i32
    return %c0_i32, %c0_i32_0 : i32, i32
  }
  func.func @transform_3(%arg0: i32) -> (i32, i32) {
    %c0_i32 = arith.constant 0 : i32
    %c0_i32_0 = arith.constant 0 : i32
    return %c0_i32, %arg0 : i32, i32
  }
}

module attributes {stable_mosaic.version = 11 : i64} {
  func.func @_fused_matmul_t_kernel(%arg0: i32, %arg1: memref<16x288xbf16, #tpu.memory_space<vmem>>, %arg2: memref<288x128xbf16, #tpu.memory_space<vmem>>, %arg3: memref<16x1xf32, #tpu.memory_space<vmem>>, %arg4: memref<16x128xbf16, #tpu.memory_space<vmem>>) attributes {dimension_semantics = [#tpu.dimension_semantics<parallel>], iteration_bounds = array<i64: 1>, scalar_prefetch = 0 : i64, scratch_operands = 0 : i64, tpu.core_type = #tpu.core_type<tc>, window_params = [{pipeline_mode = #tpu.pipeline_mode<synchronous>, transform_indices = @transform_0, window_bounds = array<i64: 16, 288>}, {transform_indices = @transform_1, window_bounds = array<i64: 288, 128>}, {pipeline_mode = #tpu.pipeline_mode<synchronous>, transform_indices = @transform_2, window_bounds = array<i64: 16, 1>}, {transform_indices = @transform_3, window_bounds = array<i64: 16, 128>}]} {
    %c0 = arith.constant 0 : index
    %c0_0 = arith.constant 0 : index
    %0 = vector.load %arg1[%c0, %c0_0] : memref<16x288xbf16, #tpu.memory_space<vmem>>, vector<16x288xbf16>
    %c0_1 = arith.constant 0 : index
    %c0_2 = arith.constant 0 : index
    %1 = vector.load %arg2[%c0_1, %c0_2] : memref<288x128xbf16, #tpu.memory_space<vmem>>, vector<288x128xbf16>
    %cst = arith.constant dense<0.000000e+00> : vector<16x128xf32>
    %2 = tpu.matmul %0, %1, %cst {dimension_numbers = #tpu.dot_dimension_numbers<[1], [0], [0], [1], [0, 0, 1, 1], [], []>} : vector<16x288xbf16>, vector<288x128xbf16>, vector<16x128xf32> -> vector<16x128xf32>
    %c0_3 = arith.constant 0 : index
    %c0_4 = arith.constant 0 : index
    %3 = vector.load %arg3[%c0_3, %c0_4] : memref<16x1xf32, #tpu.memory_space<vmem>>, vector<16x1xf32>
    %4 = vector.broadcast %3 : vector<16x1xf32> to vector<16x128xf32>
    %5 = arith.addf %2, %4 : vector<16x128xf32>
    %cst_5 = arith.constant 0.000000e+00 : f32
    %6 = vector.broadcast %cst_5 : f32 to vector<16x128xf32>
    %7 = arith.maximumf %5, %6 : vector<16x128xf32>
    %8 = arith.truncf %7 : vector<16x128xf32> to vector<16x128xbf16>
    %c0_6 = arith.constant 0 : index
    %c0_7 = arith.constant 0 : index
    %9 = vector.load %arg4[%c0_6, %c0_7] : memref<16x128xbf16, #tpu.memory_space<vmem>>, vector<16x128xbf16>
    tpu.vector_store %arg4[%c0_6, %c0_7], %8 {strides = array<i32>} : memref<16x128xbf16, #tpu.memory_space<vmem>>, vector<16x128xbf16>,
    return
  }
  func.func @transform_0(%arg0: i32) -> (i32, i32) {
    %c0_i32 = arith.constant 0 : i32
    %c0_i32_0 = arith.constant 0 : i32
    %c0_i32_1 = arith.constant 0 : i32
    return %c0_i32, %c0_i32_0 : i32, i32
  }
  func.func @transform_1(%arg0: i32) -> (i32, i32) {
    %c0_i32 = arith.constant 0 : i32
    %c0_i32_0 = arith.constant 0 : i32
    return %c0_i32, %arg0 : i32, i32
  }
  func.func @transform_2(%arg0: i32) -> (i32, i32) {
    %c0_i32 = arith.constant 0 : i32
    %c0_i32_0 = arith.constant 0 : i32
    %c0_i32_1 = arith.constant 0 : i32
    return %c0_i32, %c0_i32_0 : i32, i32
  }
  func.func @transform_3(%arg0: i32) -> (i32, i32) {
    %c0_i32 = arith.constant 0 : i32
    %c0_i32_0 = arith.constant 0 : i32
    return %c0_i32, %arg0 : i32, i32
  }
}

module attributes {stable_mosaic.version = 11 : i64} {
  func.func @_fused_matmul_t_kernel(%arg0: i32, %arg1: memref<16x144xbf16, #tpu.memory_space<vmem>>, %arg2: memref<144x128xbf16, #tpu.memory_space<vmem>>, %arg3: memref<16x1xf32, #tpu.memory_space<vmem>>, %arg4: memref<16x128xbf16, #tpu.memory_space<vmem>>) attributes {dimension_semantics = [#tpu.dimension_semantics<parallel>], iteration_bounds = array<i64: 1>, scalar_prefetch = 0 : i64, scratch_operands = 0 : i64, tpu.core_type = #tpu.core_type<tc>, window_params = [{pipeline_mode = #tpu.pipeline_mode<synchronous>, transform_indices = @transform_0, window_bounds = array<i64: 16, 144>}, {transform_indices = @transform_1, window_bounds = array<i64: 144, 128>}, {pipeline_mode = #tpu.pipeline_mode<synchronous>, transform_indices = @transform_2, window_bounds = array<i64: 16, 1>}, {transform_indices = @transform_3, window_bounds = array<i64: 16, 128>}]} {
    %c0 = arith.constant 0 : index
    %c0_0 = arith.constant 0 : index
    %0 = vector.load %arg1[%c0, %c0_0] : memref<16x144xbf16, #tpu.memory_space<vmem>>, vector<16x144xbf16>
    %c0_1 = arith.constant 0 : index
    %c0_2 = arith.constant 0 : index
    %1 = vector.load %arg2[%c0_1, %c0_2] : memref<144x128xbf16, #tpu.memory_space<vmem>>, vector<144x128xbf16>
    %cst = arith.constant dense<0.000000e+00> : vector<16x128xf32>
    %2 = tpu.matmul %0, %1, %cst {dimension_numbers = #tpu.dot_dimension_numbers<[1], [0], [0], [1], [0, 0, 1, 1], [], []>} : vector<16x144xbf16>, vector<144x128xbf16>, vector<16x128xf32> -> vector<16x128xf32>
    %c0_3 = arith.constant 0 : index
    %c0_4 = arith.constant 0 : index
    %3 = vector.load %arg3[%c0_3, %c0_4] : memref<16x1xf32, #tpu.memory_space<vmem>>, vector<16x1xf32>
    %4 = vector.broadcast %3 : vector<16x1xf32> to vector<16x128xf32>
    %5 = arith.addf %2, %4 : vector<16x128xf32>
    %cst_5 = arith.constant 0.000000e+00 : f32
    %6 = vector.broadcast %cst_5 : f32 to vector<16x128xf32>
    %7 = arith.maximumf %5, %6 : vector<16x128xf32>
    %8 = arith.truncf %7 : vector<16x128xf32> to vector<16x128xbf16>
    %c0_6 = arith.constant 0 : index
    %c0_7 = arith.constant 0 : index
    %9 = vector.load %arg4[%c0_6, %c0_7] : memref<16x128xbf16, #tpu.memory_space<vmem>>, vector<16x128xbf16>
    tpu.vector_store %arg4[%c0_6, %c0_7], %8 {strides = array<i32>} : memref<16x128xbf16, #tpu.memory_space<vmem>>, vector<16x128xbf16>,
    return
  }
  func.func @transform_0(%arg0: i32) -> (i32, i32) {
    %c0_i32 = arith.constant 0 : i32
    %c0_i32_0 = arith.constant 0 : i32
    %c0_i32_1 = arith.constant 0 : i32
    return %c0_i32, %c0_i32_0 : i32, i32
  }
  func.func @transform_1(%arg0: i32) -> (i32, i32) {
    %c0_i32 = arith.constant 0 : i32
    %c0_i32_0 = arith.constant 0 : i32
    return %c0_i32, %arg0 : i32, i32
  }
  func.func @transform_2(%arg0: i32) -> (i32, i32) {
    %c0_i32 = arith.constant 0 : i32
    %c0_i32_0 = arith.constant 0 : i32
    %c0_i32_1 = arith.constant 0 : i32
    return %c0_i32, %c0_i32_0 : i32, i32
  }
  func.func @transform_3(%arg0: i32) -> (i32, i32) {
    %c0_i32 = arith.constant 0 : i32
    %c0_i32_0 = arith.constant 0 : i32
    return %c0_i32, %arg0 : i32, i32
  }
}

module attributes {stable_mosaic.version = 11 : i64} {
  func.func @_fused_matmul_t_kernel(%arg0: i32, %arg1: memref<128x16xbf16, #tpu.memory_space<vmem>>, %arg2: memref<16x128xbf16, #tpu.memory_space<vmem>>, %arg3: memref<128x1xf32, #tpu.memory_space<vmem>>, %arg4: memref<128x128xbf16, #tpu.memory_space<vmem>>) attributes {dimension_semantics = [#tpu.dimension_semantics<parallel>], iteration_bounds = array<i64: 1>, scalar_prefetch = 0 : i64, scratch_operands = 0 : i64, tpu.core_type = #tpu.core_type<tc>, window_params = [{pipeline_mode = #tpu.pipeline_mode<synchronous>, transform_indices = @transform_0, window_bounds = array<i64: 128, 16>}, {transform_indices = @transform_1, window_bounds = array<i64: 16, 128>}, {pipeline_mode = #tpu.pipeline_mode<synchronous>, transform_indices = @transform_2, window_bounds = array<i64: 128, 1>}, {transform_indices = @transform_3, window_bounds = array<i64: 128, 128>}]} {
    %c0 = arith.constant 0 : index
    %c0_0 = arith.constant 0 : index
    %0 = vector.load %arg1[%c0, %c0_0] : memref<128x16xbf16, #tpu.memory_space<vmem>>, vector<128x16xbf16>
    %c0_1 = arith.constant 0 : index
    %c0_2 = arith.constant 0 : index
    %1 = vector.load %arg2[%c0_1, %c0_2] : memref<16x128xbf16, #tpu.memory_space<vmem>>, vector<16x128xbf16>
    %cst = arith.constant dense<0.000000e+00> : vector<128x128xf32>
    %2 = tpu.matmul %0, %1, %cst {dimension_numbers = #tpu.dot_dimension_numbers<[1], [0], [0], [1], [0, 0, 1, 1], [], []>} : vector<128x16xbf16>, vector<16x128xbf16>, vector<128x128xf32> -> vector<128x128xf32>
    %c0_3 = arith.constant 0 : index
    %c0_4 = arith.constant 0 : index
    %3 = vector.load %arg3[%c0_3, %c0_4] : memref<128x1xf32, #tpu.memory_space<vmem>>, vector<128x1xf32>
    %4 = vector.broadcast %3 : vector<128x1xf32> to vector<128x128xf32>
    %5 = arith.addf %2, %4 : vector<128x128xf32>
    %6 = arith.truncf %5 : vector<128x128xf32> to vector<128x128xbf16>
    %c0_5 = arith.constant 0 : index
    %c0_6 = arith.constant 0 : index
    %7 = vector.load %arg4[%c0_5, %c0_6] : memref<128x128xbf16, #tpu.memory_space<vmem>>, vector<128x128xbf16>
    tpu.vector_store %arg4[%c0_5, %c0_6], %6 {strides = array<i32>} : memref<128x128xbf16, #tpu.memory_space<vmem>>, vector<128x128xbf16>,
    return
  }
  func.func @transform_0(%arg0: i32) -> (i32, i32) {
    %c0_i32 = arith.constant 0 : i32
    %c0_i32_0 = arith.constant 0 : i32
    %c0_i32_1 = arith.constant 0 : i32
    return %c0_i32, %c0_i32_0 : i32, i32
  }
  func.func @transform_1(%arg0: i32) -> (i32, i32) {
    %c0_i32 = arith.constant 0 : i32
    %c0_i32_0 = arith.constant 0 : i32
    return %c0_i32, %arg0 : i32, i32
  }
  func.func @transform_2(%arg0: i32) -> (i32, i32) {
    %c0_i32 = arith.constant 0 : i32
    %c0_i32_0 = arith.constant 0 : i32
    %c0_i32_1 = arith.constant 0 : i32
    return %c0_i32, %c0_i32_0 : i32, i32
  }
  func.func @transform_3(%arg0: i32) -> (i32, i32) {
    %c0_i32 = arith.constant 0 : i32
    %c0_i32_0 = arith.constant 0 : i32
    return %c0_i32, %arg0 : i32, i32
  }
}

module attributes {stable_mosaic.version = 11 : i64} {
  func.func @_fused_matmul_t_kernel(%arg0: i32, %arg1: memref<8x144xbf16, #tpu.memory_space<vmem>>, %arg2: memref<144x512xbf16, #tpu.memory_space<vmem>>, %arg3: memref<8x1xf32, #tpu.memory_space<vmem>>, %arg4: memref<8x512xbf16, #tpu.memory_space<vmem>>) attributes {dimension_semantics = [#tpu.dimension_semantics<parallel>], iteration_bounds = array<i64: 1>, scalar_prefetch = 0 : i64, scratch_operands = 0 : i64, tpu.core_type = #tpu.core_type<tc>, window_params = [{pipeline_mode = #tpu.pipeline_mode<synchronous>, transform_indices = @transform_0, window_bounds = array<i64: 8, 144>}, {transform_indices = @transform_1, window_bounds = array<i64: 144, 512>}, {pipeline_mode = #tpu.pipeline_mode<synchronous>, transform_indices = @transform_2, window_bounds = array<i64: 8, 1>}, {transform_indices = @transform_3, window_bounds = array<i64: 8, 512>}]} {
    %c0 = arith.constant 0 : index
    %c0_0 = arith.constant 0 : index
    %0 = vector.load %arg1[%c0, %c0_0] : memref<8x144xbf16, #tpu.memory_space<vmem>>, vector<8x144xbf16>
    %c0_1 = arith.constant 0 : index
    %c0_2 = arith.constant 0 : index
    %1 = vector.load %arg2[%c0_1, %c0_2] : memref<144x512xbf16, #tpu.memory_space<vmem>>, vector<144x512xbf16>
    %cst = arith.constant dense<0.000000e+00> : vector<8x512xf32>
    %2 = tpu.matmul %0, %1, %cst {dimension_numbers = #tpu.dot_dimension_numbers<[1], [0], [0], [1], [0, 0, 1, 1], [], []>} : vector<8x144xbf16>, vector<144x512xbf16>, vector<8x512xf32> -> vector<8x512xf32>
    %c0_3 = arith.constant 0 : index
    %c0_4 = arith.constant 0 : index
    %3 = vector.load %arg3[%c0_3, %c0_4] : memref<8x1xf32, #tpu.memory_space<vmem>>, vector<8x1xf32>
    %4 = vector.broadcast %3 : vector<8x1xf32> to vector<8x512xf32>
    %5 = arith.addf %2, %4 : vector<8x512xf32>
    %cst_5 = arith.constant 0.000000e+00 : f32
    %6 = vector.broadcast %cst_5 : f32 to vector<8x512xf32>
    %7 = arith.maximumf %5, %6 : vector<8x512xf32>
    %8 = arith.truncf %7 : vector<8x512xf32> to vector<8x512xbf16>
    %c0_6 = arith.constant 0 : index
    %c0_7 = arith.constant 0 : index
    %9 = vector.load %arg4[%c0_6, %c0_7] : memref<8x512xbf16, #tpu.memory_space<vmem>>, vector<8x512xbf16>
    tpu.vector_store %arg4[%c0_6, %c0_7], %8 {strides = array<i32>} : memref<8x512xbf16, #tpu.memory_space<vmem>>, vector<8x512xbf16>,
    return
  }
  func.func @transform_0(%arg0: i32) -> (i32, i32) {
    %c0_i32 = arith.constant 0 : i32
    %c0_i32_0 = arith.constant 0 : i32
    %c0_i32_1 = arith.constant 0 : i32
    return %c0_i32, %c0_i32_0 : i32, i32
  }
  func.func @transform_1(%arg0: i32) -> (i32, i32) {
    %c0_i32 = arith.constant 0 : i32
    %c0_i32_0 = arith.constant 0 : i32
    return %c0_i32, %arg0 : i32, i32
  }
  func.func @transform_2(%arg0: i32) -> (i32, i32) {
    %c0_i32 = arith.constant 0 : i32
    %c0_i32_0 = arith.constant 0 : i32
    %c0_i32_1 = arith.constant 0 : i32
    return %c0_i32, %c0_i32_0 : i32, i32
  }
  func.func @transform_3(%arg0: i32) -> (i32, i32) {
    %c0_i32 = arith.constant 0 : i32
    %c0_i32_0 = arith.constant 0 : i32
    return %c0_i32, %arg0 : i32, i32
  }
}

module attributes {stable_mosaic.version = 11 : i64} {
  func.func @_fused_matmul_t_kernel(%arg0: i32, %arg1: memref<8x72xbf16, #tpu.memory_space<vmem>>, %arg2: memref<72x512xbf16, #tpu.memory_space<vmem>>, %arg3: memref<8x1xf32, #tpu.memory_space<vmem>>, %arg4: memref<8x512xbf16, #tpu.memory_space<vmem>>) attributes {dimension_semantics = [#tpu.dimension_semantics<parallel>], iteration_bounds = array<i64: 1>, scalar_prefetch = 0 : i64, scratch_operands = 0 : i64, tpu.core_type = #tpu.core_type<tc>, window_params = [{pipeline_mode = #tpu.pipeline_mode<synchronous>, transform_indices = @transform_0, window_bounds = array<i64: 8, 72>}, {transform_indices = @transform_1, window_bounds = array<i64: 72, 512>}, {pipeline_mode = #tpu.pipeline_mode<synchronous>, transform_indices = @transform_2, window_bounds = array<i64: 8, 1>}, {transform_indices = @transform_3, window_bounds = array<i64: 8, 512>}]} {
    %c0 = arith.constant 0 : index
    %c0_0 = arith.constant 0 : index
    %0 = vector.load %arg1[%c0, %c0_0] : memref<8x72xbf16, #tpu.memory_space<vmem>>, vector<8x72xbf16>
    %c0_1 = arith.constant 0 : index
    %c0_2 = arith.constant 0 : index
    %1 = vector.load %arg2[%c0_1, %c0_2] : memref<72x512xbf16, #tpu.memory_space<vmem>>, vector<72x512xbf16>
    %cst = arith.constant dense<0.000000e+00> : vector<8x512xf32>
    %2 = tpu.matmul %0, %1, %cst {dimension_numbers = #tpu.dot_dimension_numbers<[1], [0], [0], [1], [0, 0, 1, 1], [], []>} : vector<8x72xbf16>, vector<72x512xbf16>, vector<8x512xf32> -> vector<8x512xf32>
    %c0_3 = arith.constant 0 : index
    %c0_4 = arith.constant 0 : index
    %3 = vector.load %arg3[%c0_3, %c0_4] : memref<8x1xf32, #tpu.memory_space<vmem>>, vector<8x1xf32>
    %4 = vector.broadcast %3 : vector<8x1xf32> to vector<8x512xf32>
    %5 = arith.addf %2, %4 : vector<8x512xf32>
    %cst_5 = arith.constant 0.000000e+00 : f32
    %6 = vector.broadcast %cst_5 : f32 to vector<8x512xf32>
    %7 = arith.maximumf %5, %6 : vector<8x512xf32>
    %8 = arith.truncf %7 : vector<8x512xf32> to vector<8x512xbf16>
    %c0_6 = arith.constant 0 : index
    %c0_7 = arith.constant 0 : index
    %9 = vector.load %arg4[%c0_6, %c0_7] : memref<8x512xbf16, #tpu.memory_space<vmem>>, vector<8x512xbf16>
    tpu.vector_store %arg4[%c0_6, %c0_7], %8 {strides = array<i32>} : memref<8x512xbf16, #tpu.memory_space<vmem>>, vector<8x512xbf16>,
    return
  }
  func.func @transform_0(%arg0: i32) -> (i32, i32) {
    %c0_i32 = arith.constant 0 : i32
    %c0_i32_0 = arith.constant 0 : i32
    %c0_i32_1 = arith.constant 0 : i32
    return %c0_i32, %c0_i32_0 : i32, i32
  }
  func.func @transform_1(%arg0: i32) -> (i32, i32) {
    %c0_i32 = arith.constant 0 : i32
    %c0_i32_0 = arith.constant 0 : i32
    return %c0_i32, %arg0 : i32, i32
  }
  func.func @transform_2(%arg0: i32) -> (i32, i32) {
    %c0_i32 = arith.constant 0 : i32
    %c0_i32_0 = arith.constant 0 : i32
    %c0_i32_1 = arith.constant 0 : i32
    return %c0_i32, %c0_i32_0 : i32, i32
  }
  func.func @transform_3(%arg0: i32) -> (i32, i32) {
    %c0_i32 = arith.constant 0 : i32
    %c0_i32_0 = arith.constant 0 : i32
    return %c0_i32, %arg0 : i32, i32
  }
}

module attributes {stable_mosaic.version = 11 : i64} {
  func.func @_fused_matmul_t_kernel(%arg0: i32, %arg1: memref<64x8xbf16, #tpu.memory_space<vmem>>, %arg2: memref<8x512xbf16, #tpu.memory_space<vmem>>, %arg3: memref<64x1xf32, #tpu.memory_space<vmem>>, %arg4: memref<64x512xbf16, #tpu.memory_space<vmem>>) attributes {dimension_semantics = [#tpu.dimension_semantics<parallel>], iteration_bounds = array<i64: 1>, scalar_prefetch = 0 : i64, scratch_operands = 0 : i64, tpu.core_type = #tpu.core_type<tc>, window_params = [{pipeline_mode = #tpu.pipeline_mode<synchronous>, transform_indices = @transform_0, window_bounds = array<i64: 64, 8>}, {transform_indices = @transform_1, window_bounds = array<i64: 8, 512>}, {pipeline_mode = #tpu.pipeline_mode<synchronous>, transform_indices = @transform_2, window_bounds = array<i64: 64, 1>}, {transform_indices = @transform_3, window_bounds = array<i64: 64, 512>}]} {
    %c0 = arith.constant 0 : index
    %c0_0 = arith.constant 0 : index
    %0 = vector.load %arg1[%c0, %c0_0] : memref<64x8xbf16, #tpu.memory_space<vmem>>, vector<64x8xbf16>
    %c0_1 = arith.constant 0 : index
    %c0_2 = arith.constant 0 : index
    %1 = vector.load %arg2[%c0_1, %c0_2] : memref<8x512xbf16, #tpu.memory_space<vmem>>, vector<8x512xbf16>
    %cst = arith.constant dense<0.000000e+00> : vector<64x512xf32>
    %2 = tpu.matmul %0, %1, %cst {dimension_numbers = #tpu.dot_dimension_numbers<[1], [0], [0], [1], [0, 0, 1, 1], [], []>} : vector<64x8xbf16>, vector<8x512xbf16>, vector<64x512xf32> -> vector<64x512xf32>
    %c0_3 = arith.constant 0 : index
    %c0_4 = arith.constant 0 : index
    %3 = vector.load %arg3[%c0_3, %c0_4] : memref<64x1xf32, #tpu.memory_space<vmem>>, vector<64x1xf32>
    %4 = vector.broadcast %3 : vector<64x1xf32> to vector<64x512xf32>
    %5 = arith.addf %2, %4 : vector<64x512xf32>
    %6 = arith.truncf %5 : vector<64x512xf32> to vector<64x512xbf16>
    %c0_5 = arith.constant 0 : index
    %c0_6 = arith.constant 0 : index
    %7 = vector.load %arg4[%c0_5, %c0_6] : memref<64x512xbf16, #tpu.memory_space<vmem>>, vector<64x512xbf16>
    tpu.vector_store %arg4[%c0_5, %c0_6], %6 {strides = array<i32>} : memref<64x512xbf16, #tpu.memory_space<vmem>>, vector<64x512xbf16>,
    return
  }
  func.func @transform_0(%arg0: i32) -> (i32, i32) {
    %c0_i32 = arith.constant 0 : i32
    %c0_i32_0 = arith.constant 0 : i32
    %c0_i32_1 = arith.constant 0 : i32
    return %c0_i32, %c0_i32_0 : i32, i32
  }
  func.func @transform_1(%arg0: i32) -> (i32, i32) {
    %c0_i32 = arith.constant 0 : i32
    %c0_i32_0 = arith.constant 0 : i32
    return %c0_i32, %arg0 : i32, i32
  }
  func.func @transform_2(%arg0: i32) -> (i32, i32) {
    %c0_i32 = arith.constant 0 : i32
    %c0_i32_0 = arith.constant 0 : i32
    %c0_i32_1 = arith.constant 0 : i32
    return %c0_i32, %c0_i32_0 : i32, i32
  }
  func.func @transform_3(%arg0: i32) -> (i32, i32) {
    %c0_i32 = arith.constant 0 : i32
    %c0_i32_0 = arith.constant 0 : i32
    return %c0_i32, %arg0 : i32, i32
  }
}

module attributes {stable_mosaic.version = 11 : i64} {
  func.func @_fused_matmul_t_kernel(%arg0: i32, %arg1: memref<8x72xbf16, #tpu.memory_space<vmem>>, %arg2: memref<72x1024xbf16, #tpu.memory_space<vmem>>, %arg3: memref<8x1xf32, #tpu.memory_space<vmem>>, %arg4: memref<8x1024xbf16, #tpu.memory_space<vmem>>) attributes {dimension_semantics = [#tpu.dimension_semantics<parallel>], iteration_bounds = array<i64: 8>, scalar_prefetch = 0 : i64, scratch_operands = 0 : i64, tpu.core_type = #tpu.core_type<tc>, window_params = [{pipeline_mode = #tpu.pipeline_mode<synchronous>, transform_indices = @transform_0, window_bounds = array<i64: 8, 72>}, {transform_indices = @transform_1, window_bounds = array<i64: 72, 1024>}, {pipeline_mode = #tpu.pipeline_mode<synchronous>, transform_indices = @transform_2, window_bounds = array<i64: 8, 1>}, {transform_indices = @transform_3, window_bounds = array<i64: 8, 1024>}]} {
    %c0 = arith.constant 0 : index
    %c0_0 = arith.constant 0 : index
    %0 = vector.load %arg1[%c0, %c0_0] : memref<8x72xbf16, #tpu.memory_space<vmem>>, vector<8x72xbf16>
    %c0_1 = arith.constant 0 : index
    %c0_2 = arith.constant 0 : index
    %1 = vector.load %arg2[%c0_1, %c0_2] : memref<72x1024xbf16, #tpu.memory_space<vmem>>, vector<72x1024xbf16>
    %cst = arith.constant dense<0.000000e+00> : vector<8x1024xf32>
    %2 = tpu.matmul %0, %1, %cst {dimension_numbers = #tpu.dot_dimension_numbers<[1], [0], [0], [1], [0, 0, 1, 1], [], []>} : vector<8x72xbf16>, vector<72x1024xbf16>, vector<8x1024xf32> -> vector<8x1024xf32>
    %c0_3 = arith.constant 0 : index
    %c0_4 = arith.constant 0 : index
    %3 = vector.load %arg3[%c0_3, %c0_4] : memref<8x1xf32, #tpu.memory_space<vmem>>, vector<8x1xf32>
    %4 = vector.broadcast %3 : vector<8x1xf32> to vector<8x1024xf32>
    %5 = arith.addf %2, %4 : vector<8x1024xf32>
    %cst_5 = arith.constant 0.000000e+00 : f32
    %6 = vector.broadcast %cst_5 : f32 to vector<8x1024xf32>
    %7 = arith.maximumf %5, %6 : vector<8x1024xf32>
    %8 = arith.truncf %7 : vector<8x1024xf32> to vector<8x1024xbf16>
    %c0_6 = arith.constant 0 : index
    %c0_7 = arith.constant 0 : index
    %9 = vector.load %arg4[%c0_6, %c0_7] : memref<8x1024xbf16, #tpu.memory_space<vmem>>, vector<8x1024xbf16>
    tpu.vector_store %arg4[%c0_6, %c0_7], %8 {strides = array<i32>} : memref<8x1024xbf16, #tpu.memory_space<vmem>>, vector<8x1024xbf16>,
    return
  }
  func.func @transform_0(%arg0: i32) -> (i32, i32) {
    %c0_i32 = arith.constant 0 : i32
    %c0_i32_0 = arith.constant 0 : i32
    %c0_i32_1 = arith.constant 0 : i32
    return %c0_i32, %c0_i32_0 : i32, i32
  }
  func.func @transform_1(%arg0: i32) -> (i32, i32) {
    %c0_i32 = arith.constant 0 : i32
    %c0_i32_0 = arith.constant 0 : i32
    return %c0_i32, %arg0 : i32, i32
  }
  func.func @transform_2(%arg0: i32) -> (i32, i32) {
    %c0_i32 = arith.constant 0 : i32
    %c0_i32_0 = arith.constant 0 : i32
    %c0_i32_1 = arith.constant 0 : i32
    return %c0_i32, %c0_i32_0 : i32, i32
  }
  func.func @transform_3(%arg0: i32) -> (i32, i32) {
    %c0_i32 = arith.constant 0 : i32
    %c0_i32_0 = arith.constant 0 : i32
    return %c0_i32, %arg0 : i32, i32
  }
}

module attributes {stable_mosaic.version = 11 : i64} {
  func.func @_fused_matmul_t_kernel(%arg0: i32, %arg1: memref<8x40xbf16, #tpu.memory_space<vmem>>, %arg2: memref<40x1024xbf16, #tpu.memory_space<vmem>>, %arg3: memref<8x1xf32, #tpu.memory_space<vmem>>, %arg4: memref<8x1024xbf16, #tpu.memory_space<vmem>>) attributes {dimension_semantics = [#tpu.dimension_semantics<parallel>], iteration_bounds = array<i64: 8>, scalar_prefetch = 0 : i64, scratch_operands = 0 : i64, tpu.core_type = #tpu.core_type<tc>, window_params = [{pipeline_mode = #tpu.pipeline_mode<synchronous>, transform_indices = @transform_0, window_bounds = array<i64: 8, 40>}, {transform_indices = @transform_1, window_bounds = array<i64: 40, 1024>}, {pipeline_mode = #tpu.pipeline_mode<synchronous>, transform_indices = @transform_2, window_bounds = array<i64: 8, 1>}, {transform_indices = @transform_3, window_bounds = array<i64: 8, 1024>}]} {
    %c0 = arith.constant 0 : index
    %c0_0 = arith.constant 0 : index
    %0 = vector.load %arg1[%c0, %c0_0] : memref<8x40xbf16, #tpu.memory_space<vmem>>, vector<8x40xbf16>
    %c0_1 = arith.constant 0 : index
    %c0_2 = arith.constant 0 : index
    %1 = vector.load %arg2[%c0_1, %c0_2] : memref<40x1024xbf16, #tpu.memory_space<vmem>>, vector<40x1024xbf16>
    %cst = arith.constant dense<0.000000e+00> : vector<8x1024xf32>
    %2 = tpu.matmul %0, %1, %cst {dimension_numbers = #tpu.dot_dimension_numbers<[1], [0], [0], [1], [0, 0, 1, 1], [], []>} : vector<8x40xbf16>, vector<40x1024xbf16>, vector<8x1024xf32> -> vector<8x1024xf32>
    %c0_3 = arith.constant 0 : index
    %c0_4 = arith.constant 0 : index
    %3 = vector.load %arg3[%c0_3, %c0_4] : memref<8x1xf32, #tpu.memory_space<vmem>>, vector<8x1xf32>
    %4 = vector.broadcast %3 : vector<8x1xf32> to vector<8x1024xf32>
    %5 = arith.addf %2, %4 : vector<8x1024xf32>
    %cst_5 = arith.constant 0.000000e+00 : f32
    %6 = vector.broadcast %cst_5 : f32 to vector<8x1024xf32>
    %7 = arith.maximumf %5, %6 : vector<8x1024xf32>
    %8 = arith.truncf %7 : vector<8x1024xf32> to vector<8x1024xbf16>
    %c0_6 = arith.constant 0 : index
    %c0_7 = arith.constant 0 : index
    %9 = vector.load %arg4[%c0_6, %c0_7] : memref<8x1024xbf16, #tpu.memory_space<vmem>>, vector<8x1024xbf16>
    tpu.vector_store %arg4[%c0_6, %c0_7], %8 {strides = array<i32>} : memref<8x1024xbf16, #tpu.memory_space<vmem>>, vector<8x1024xbf16>,
    return
  }
  func.func @transform_0(%arg0: i32) -> (i32, i32) {
    %c0_i32 = arith.constant 0 : i32
    %c0_i32_0 = arith.constant 0 : i32
    %c0_i32_1 = arith.constant 0 : i32
    return %c0_i32, %c0_i32_0 : i32, i32
  }
  func.func @transform_1(%arg0: i32) -> (i32, i32) {
    %c0_i32 = arith.constant 0 : i32
    %c0_i32_0 = arith.constant 0 : i32
    return %c0_i32, %arg0 : i32, i32
  }
  func.func @transform_2(%arg0: i32) -> (i32, i32) {
    %c0_i32 = arith.constant 0 : i32
    %c0_i32_0 = arith.constant 0 : i32
    %c0_i32_1 = arith.constant 0 : i32
    return %c0_i32, %c0_i32_0 : i32, i32
  }
  func.func @transform_3(%arg0: i32) -> (i32, i32) {
    %c0_i32 = arith.constant 0 : i32
    %c0_i32_0 = arith.constant 0 : i32
    return %c0_i32, %arg0 : i32, i32
  }
}

module attributes {stable_mosaic.version = 11 : i64} {
  func.func @_fused_matmul_t_kernel(%arg0: i32, %arg1: memref<8x8xbf16, #tpu.memory_space<vmem>>, %arg2: memref<8x1024xbf16, #tpu.memory_space<vmem>>, %arg3: memref<8x1xf32, #tpu.memory_space<vmem>>, %arg4: memref<8x1024xf32, #tpu.memory_space<vmem>>) attributes {dimension_semantics = [#tpu.dimension_semantics<parallel>], iteration_bounds = array<i64: 8>, scalar_prefetch = 0 : i64, scratch_operands = 0 : i64, tpu.core_type = #tpu.core_type<tc>, window_params = [{pipeline_mode = #tpu.pipeline_mode<synchronous>, transform_indices = @transform_0, window_bounds = array<i64: 8, 8>}, {transform_indices = @transform_1, window_bounds = array<i64: 8, 1024>}, {pipeline_mode = #tpu.pipeline_mode<synchronous>, transform_indices = @transform_2, window_bounds = array<i64: 8, 1>}, {transform_indices = @transform_3, window_bounds = array<i64: 8, 1024>}]} {
    %c0 = arith.constant 0 : index
    %c0_0 = arith.constant 0 : index
    %0 = vector.load %arg1[%c0, %c0_0] : memref<8x8xbf16, #tpu.memory_space<vmem>>, vector<8x8xbf16>
    %c0_1 = arith.constant 0 : index
    %c0_2 = arith.constant 0 : index
    %1 = vector.load %arg2[%c0_1, %c0_2] : memref<8x1024xbf16, #tpu.memory_space<vmem>>, vector<8x1024xbf16>
    %cst = arith.constant dense<0.000000e+00> : vector<8x1024xf32>
    %2 = tpu.matmul %0, %1, %cst {dimension_numbers = #tpu.dot_dimension_numbers<[1], [0], [0], [1], [0, 0, 1, 1], [], []>} : vector<8x8xbf16>, vector<8x1024xbf16>, vector<8x1024xf32> -> vector<8x1024xf32>
    %c0_3 = arith.constant 0 : index
    %c0_4 = arith.constant 0 : index
    %3 = vector.load %arg3[%c0_3, %c0_4] : memref<8x1xf32, #tpu.memory_space<vmem>>, vector<8x1xf32>
    %4 = vector.broadcast %3 : vector<8x1xf32> to vector<8x1024xf32>
    %5 = arith.addf %2, %4 : vector<8x1024xf32>
    %c0_5 = arith.constant 0 : index
    %c0_6 = arith.constant 0 : index
    %6 = vector.load %arg4[%c0_5, %c0_6] : memref<8x1024xf32, #tpu.memory_space<vmem>>, vector<8x1024xf32>
    tpu.vector_store %arg4[%c0_5, %c0_6], %5 {strides = array<i32>} : memref<8x1024xf32, #tpu.memory_space<vmem>>, vector<8x1024xf32>,
    return
  }
  func.func @transform_0(%arg0: i32) -> (i32, i32) {
    %c0_i32 = arith.constant 0 : i32
    %c0_i32_0 = arith.constant 0 : i32
    %c0_i32_1 = arith.constant 0 : i32
    return %c0_i32, %c0_i32_0 : i32, i32
  }
  func.func @transform_1(%arg0: i32) -> (i32, i32) {
    %c0_i32 = arith.constant 0 : i32
    %c0_i32_0 = arith.constant 0 : i32
    return %c0_i32, %arg0 : i32, i32
  }
  func.func @transform_2(%arg0: i32) -> (i32, i32) {
    %c0_i32 = arith.constant 0 : i32
    %c0_i32_0 = arith.constant 0 : i32
    %c0_i32_1 = arith.constant 0 : i32
    return %c0_i32, %c0_i32_0 : i32, i32
  }
  func.func @transform_3(%arg0: i32) -> (i32, i32) {
    %c0_i32 = arith.constant 0 : i32
    %c0_i32_0 = arith.constant 0 : i32
    return %c0_i32, %arg0 : i32, i32
  }
}

</mosaic_0001>

<bundles_post_ra>
// kernel: decoder_unet_forward.10
= control target key start
LH: loop header
LB: loop body
LE: loop exit
PB: predicated region body
PF: predicated region fallthrough
CT: control target
= control target key end

     0   :  { %v236_v0 = vmov 0   ;;  %vm107_vm0 = vcmask 261120   ;;  %s311_s2 = inlined_call_operand.vmem [shape: f32[64,1], index: 2, kind: input, shape index: {}]   ;;  %s312_s1 = inlined_call_operand.vmem [shape: bf16[32,128], index: 1, kind: input, shape index: {}]   ;;  %s313_s0 = inlined_call_operand.vmem [shape: bf16[64,32], index: 0, kind: input, shape index: {}]   ;;  %s314_s3 = inlined_call_operand.vmem [shape: bf16[64,128], index: 3, kind: output, shape index: {}]  }
   0x1   :  { %234 = vset.pattern.permute.xlu1 %v236_v0  ;;  %233 = vset.pattern.permute.xlu0 %v236_v0  ;;  %v29_v1 = vld [vmem:[%s311_s2 + $0x10] sm:$0xff]  ;;  %v27_v2 = vld [vmem:[%s311_s2] sm:$0xff]  ;;  %v202_v3 = vld [vmem:[%s312_s1 + $0x8] sm:$0xff] }
   0x2   :  { %47 = vperm.xlu1 %234, %v29_v1   ;;  %37 = vperm.xlu0 %233, %v27_v2   ;;  %v201_v4 = vld [vmem:[%s312_s1] sm:$0xff]  ;;  %v198_v7 = vld [vmem:[%s313_s0 + $0x8] sm:$0xff]  ;;  %v199_v8 = vld [vmem:[%s313_s0 + $0x10] sm:$0xff] }
   0x3   :  { %126 = vmatpush.bf16.msra.mxu0 %v202_v3  ;;  %226 = vmatpush.bf16.msra.mxu1 %v202_v3  ;;  %v31_v5 = vld [vmem:[%s311_s2 + $0x20] sm:$0xff]  ;;  %v200_v9 = vld [vmem:[%s313_s0 + $0x18] sm:$0xff]  ;;  %v28_v11 = vld [vmem:[%s311_s2 + $0x8] sm:$0xff] }
   0x4   :  { %227 = vmatpush.bf16.msra.mxu2 %v202_v3  ;;  %228 = vmatpush.bf16.msra.mxu3 %v202_v3  ;;  %v197_v6 = vld [vmem:[%s313_s0] sm:$0xff]  ;;  %v30_v10 = vld [vmem:[%s311_s2 + $0x18] sm:$0xff]  ;;  %v32_v12 = vld [vmem:[%s311_s2 + $0x28] sm:$0xff] }
   0x5   :  { %235 = vset.pattern.permute.xlu2 %v236_v0  ;;  %v34_v13 = vld [vmem:[%s311_s2 + $0x38] sm:$0xff]  ;;  %v33_v14 = vld [vmem:[%s311_s2 + $0x30] sm:$0xff] }
   0x6   :  { %57 = vperm.xlu2 %235, %v31_v5  }
   0x7   :  { %127 = vmatpush.bf16.msra.mxu0 %v201_v4  ;;  %229 = vmatpush.bf16.msra.mxu1 %v201_v4 }
   0x8   :  { %230 = vmatpush.bf16.msra.mxu2 %v201_v4  ;;  %231 = vmatpush.bf16.msra.mxu3 %v201_v4 }
   0xa   :  { %193 = vmatmul.msk.bf16.vlgmr.msra.gmra.mxu0 %vm107_vm0, %v197_v6  ;;  %194 = vmatmul.msk.bf16.vlgmr.msra.gmra.mxu1 %vm107_vm0, %v198_v7 }
   0xb   :  { %195 = vmatmul.msk.bf16.vlgmr.msra.gmra.mxu2 %vm107_vm0, %v199_v8  ;;  %196 = vmatmul.msk.bf16.vlgmr.msra.gmra.mxu3 %vm107_vm0, %v200_v9 }
   0xc   :  { %52 = vperm.xlu1 %234, %v30_v10   ;;  %42 = vperm.xlu0 %233, %v28_v11  }
   0xe   :  { %62 = vperm.xlu2 %235, %v32_v12  }
  0x14   :  { %72 = vperm.xlu1 %234, %v34_v13   ;;  %67 = vperm.xlu0 %233, %v33_v14  }
  0x60   :  { %v58_v19 = vpop.permute.xlu2 %57 }
  0x68   :  { %v63_v32 = vpop.permute.xlu2 %62 }
  0x74   :  { %v48_v15 = vpop.permute.xlu1 %47  ;;  %v38_v16 = vpop.permute.xlu0 %37 }
  0x7e   :  { %v53_v20 = vpop.permute.xlu1 %52  ;;  %v43_v21 = vpop.permute.xlu0 %42 }
  0x86   :  { %v73_v33 = vpop.permute.xlu1 %72  ;;  %v68_v34 = vpop.permute.xlu0 %67 }
  0x87   :  { %v129_v17 = vpop.f32.mrf.mxu0  ;;  %v134_v18 = vpop.f32.mrf.mxu1 }
  0x88   :  { %v130_v26 = vadd.f32 %v129_v17, %v38_v16  ;;  %v135_v27 = vadd.f32 %v134_v18, %v48_v15 }
  0x8e   :  { %v139_v22 = vpop.f32.mrf.mxu2  ;;  %v144_v23 = vpop.f32.mrf.mxu3 }
  0x8f   :  { %v131_v24 = vpop.f32.mrf.mxu0  ;;  %v136_v25 = vpop.f32.mrf.mxu1  ;;  %v140_v37 = vadd.f32 %v139_v22, %v58_v19  ;;  %v145_v38 = vadd.f32 %v144_v23, %v68_v34 }
  0x90   :  { %v132_v28 = vadd.f32 %v131_v24, %v43_v21  ;;  %v137_v29 = vadd.f32 %v136_v25, %v53_v20 }
  0x92   :  { %v206_v30 = vpack.c.bf16 %v132_v28, %v130_v26  ;;  %v211_v31 = vpack.c.bf16 %v137_v29, %v135_v27 }
  0x94   :  { %207 = vst [vmem:[%s314_s3] sm:$0xff] %v206_v30  }
  0x95   :  { %223 = vst [vmem:[%s314_s3 + $0x8] sm:$0xff] %v211_v31  }
  0x96   :  { %v141_v35 = vpop.f32.mrf.mxu2  ;;  %v146_v36 = vpop.f32.mrf.mxu3 }
  0x97   :  { %v142_v39 = vadd.f32 %v141_v35, %v63_v32  ;;  %v147_v40 = vadd.f32 %v146_v36, %v73_v33 }
  0x99   :  { %v216_v41 = vpack.c.bf16 %v142_v39, %v140_v37  ;;  %v221_v42 = vpack.c.bf16 %v147_v40, %v145_v38 }
  0x9b   :  { %224 = vst [vmem:[%s314_s3 + $0x10] sm:$0xff] %v216_v41  }
  0x9c   :  { %225 = vst [vmem:[%s314_s3 + $0x18] sm:$0xff] %v221_v42  }

// kernel: decoder_unet_forward.11
= control target key start
LH: loop header
LB: loop body
LE: loop exit
PB: predicated region body
PF: predicated region fallthrough
CT: control target
= control target key end

     0   :  { %v359_v5 = vmov 0   ;;  %vm190_vm0 = vcmask 261120   ;;  %s461_s1 = inlined_call_operand.vmem [shape: bf16[288,128], index: 1, kind: input, shape index: {}]   ;;  %s462_s0 = inlined_call_operand.vmem [shape: bf16[16,288], index: 0, kind: input, shape index: {}]   ;;  %s463_s2 = inlined_call_operand.vmem [shape: f32[16,1], index: 2, kind: input, shape index: {}]   ;;  %s464_s3 = inlined_call_operand.vmem [shape: bf16[16,128], index: 3, kind: output, shape index: {}]  }
   0x1   :  { %v341_v0 = vld [vmem:[%s461_s1 + $0x38] sm:$0xff]  ;;  %v340_v2 = vld [vmem:[%s461_s1 + $0x30] sm:$0xff]  ;;  %v351_v4 = vld [vmem:[%s461_s1 + $0x88] sm:$0xff]  ;;  %358 = vset.pattern.permute.xlu0 %v359_v5 }
   0x2   :  { %v349_v1 = vld [vmem:[%s461_s1 + $0x78] sm:$0xff]  ;;  %194 = vmatpush.bf16.msra.mxu0 %v341_v0  ;;  %v348_v3 = vld [vmem:[%s461_s1 + $0x70] sm:$0xff]  ;;  %228 = vmatpush.bf16.msra.mxu2 %v351_v4  ;;  %v350_v6 = vld [vmem:[%s461_s1 + $0x80] sm:$0xff] }
   0x3   :  { %208 = vmatpush.bf16.msra.mxu1 %v349_v1  ;;  %v256_v7 = vld [vmem:[%s462_s0 + $0x8] sm:$0xf]  ;;  %v333_v8 = vld [vmem:[%s462_s0 + $0x10] sm:$0xf0]  ;;  %v55_v12 = vld [vmem:[%s463_s2] sm:$0xff] }
   0x4   :  { %v339_v9 = vld [vmem:[%s461_s1 + $0x28] sm:$0xff]  ;;  %v257_v11 = vor.u32 %v333_v8, %v256_v7  ;;  %59 = vperm.xlu0 %358, %v55_v12   ;;  %v338_v13 = vld [vmem:[%s461_s1 + $0x20] sm:$0xff]  ;;  %v337_v15 = vld [vmem:[%s461_s1 + $0x18] sm:$0xff] }
   0x5   :  { %v347_v10 = vld [vmem:[%s461_s1 + $0x68] sm:$0xff]  ;;  %v346_v14 = vld [vmem:[%s461_s1 + $0x60] sm:$0xff]  ;;  %v345_v16 = vld [vmem:[%s461_s1 + $0x58] sm:$0xff] }
   0x6   :  { %195 = vmatpush.bf16.msra.mxu0 %v340_v2  ;;  %229 = vmatpush.bf16.msra.mxu2 %v350_v6  ;;  %v56_v17 = vld [vmem:[%s463_s2 + $0x8] sm:$0xff]  ;;  %v336_v18 = vld [vmem:[%s461_s1 + $0x10] sm:$0xff]  ;;  %v334_v22 = vld [vmem:[%s461_s1] sm:$0xff] }
   0x7   :  { %209 = vmatpush.bf16.msra.mxu1 %v348_v3  ;;  %v344_v19 = vld [vmem:[%s461_s1 + $0x50] sm:$0xff]  ;;  %v335_v20 = vld [vmem:[%s461_s1 + $0x8] sm:$0xff]  ;;  %v342_v23 = vld [vmem:[%s461_s1 + $0x40] sm:$0xff] }
   0x8   :  { %v343_v21 = vld [vmem:[%s461_s1 + $0x48] sm:$0xff]  ;;  %v248_v24 = vld [vmem:[%s462_s0] sm:$0xf]  ;;  %v331_v26 = vld [vmem:[%s462_s0 + $0x4] sm:$0xf] }
   0x9   :  { %330 = vmatmul.msk.bf16.vlgmr.msra.gmra.mxu2 %vm190_vm0, %v257_v11  ;;  %v332_v25 = vld [vmem:[%s462_s0 + $0x8] sm:$0xf0]  ;;  %v250_v27 = vld [vmem:[%s462_s0 + $0xc] sm:$0xf0] }
   0xa   :  { %196 = vmatpush.bf16.msra.mxu0 %v339_v9  ;;  %v249_v28 = vor.u32 %v332_v25, %v248_v24  ;;  %v253_v29 = vor.u32 %v331_v26, %v250_v27 }
   0xb   :  { %210 = vmatpush.bf16.msra.mxu1 %v347_v10 }
   0xc   :  { %64 = vperm.xlu0 %358, %v56_v17  }
   0xe   :  { %197 = vmatpush.bf16.msra.mxu0 %v338_v13 }
   0xf   :  { %211 = vmatpush.bf16.msra.mxu1 %v346_v14 }
  0x12   :  { %198 = vmatpush.bf16.msra.mxu0 %v337_v15 }
  0x13   :  { %212 = vmatpush.bf16.msra.mxu1 %v345_v16 }
  0x16   :  { %199 = vmatpush.bf16.msra.mxu0 %v336_v18 }
  0x17   :  { %213 = vmatpush.bf16.msra.mxu1 %v344_v19 }
  0x1a   :  { %200 = vmatpush.bf16.msra.mxu0 %v335_v20 }
  0x1b   :  { %214 = vmatpush.bf16.msra.mxu1 %v343_v21 }
  0x1e   :  { %201 = vmatpush.bf16.msra.mxu0 %v334_v22 }
  0x1f   :  { %215 = vmatpush.bf16.msra.mxu1 %v342_v23 }
  0x21   :  { %202 = vmatmul.bf16.vlgmr.msra.gmra.mxu0 %v249_v28 }
  0x22   :  { %216 = vmatmul.bf16.vlgmr.msra.gmra.mxu1 %v253_v29 }
  0x76   :  { %v60_v30 = vpop.permute.xlu0 %59 }
  0x7e   :  { %v65_v36 = vpop.permute.xlu0 %64 }
  0x8c   :  { %v231_v33 = vpop.f32.mrf.mxu2 }
  0x94   :  { %v233_v42 = vpop.f32.mrf.mxu2 }
  0x9e   :  { %v203_v31 = vpop.f32.mrf.mxu0 }
  0x9f   :  { %v217_v32 = vpop.f32.mrf.mxu1  ;;  %v204_v34 = vadd.f32 %v203_v31, %v60_v30 }
  0xa1   :  { %v218_v35 = vadd.f32 %v217_v32, %v204_v34 }
  0xa3   :  { %v232_v40 = vadd.f32 %v231_v33, %v218_v35 }
  0xa5   :  { %v236_v44 = vmax.f32 %v232_v40, 0.0 }
  0xa6   :  { %v205_v37 = vpop.f32.mrf.mxu0 }
  0xa7   :  { %v206_v38 = vadd.f32 %v205_v37, %v65_v36  ;;  %v219_v39 = vpop.f32.mrf.mxu1 }
  0xa9   :  { %v220_v41 = vadd.f32 %v219_v39, %v206_v38 }
  0xab   :  { %v234_v43 = vadd.f32 %v233_v42, %v220_v41 }
  0xad   :  { %v237_v45 = vmax.f32 %v234_v43, 0.0 }
  0xaf   :  { %v355_v46 = vpack.c.bf16 %v237_v45, %v236_v44 }
  0xb1   :  { %356 = vst [vmem:[%s464_s3] sm:$0xff] %v355_v46  }

// kernel: decoder_unet_forward.12
= control target key start
LH: loop header
LB: loop body
LE: loop exit
PB: predicated region body
PF: predicated region fallthrough
CT: control target
= control target key end

     0   :  { %v215_v4 = vmov 0   ;;  %vm110_vm0 = vcmask 130048   ;;  %s284_s1 = inlined_call_operand.vmem [shape: bf16[144,128], index: 1, kind: input, shape index: {}]   ;;  %s285_s0 = inlined_call_operand.vmem [shape: bf16[16,144], index: 0, kind: input, shape index: {}]   ;;  %s286_s2 = inlined_call_operand.vmem [shape: f32[16,1], index: 2, kind: input, shape index: {}]   ;;  %s287_s3 = inlined_call_operand.vmem [shape: bf16[16,128], index: 3, kind: output, shape index: {}]  }
   0x1   :  { %v206_v0 = vld [vmem:[%s284_s1 + $0x38] sm:$0xff]  ;;  %v205_v1 = vld [vmem:[%s284_s1 + $0x30] sm:$0xff]  ;;  %v207_v2 = vld [vmem:[%s284_s1 + $0x40] sm:$0xff]  ;;  %214 = vset.pattern.permute.xlu0 %v215_v4 }
   0x2   :  { %114 = vmatpush.bf16.msra.mxu0 %v206_v0  ;;  %v197_v3 = vld [vmem:[%s285_s0 + $0x4] sm:$0xf]  ;;  %v156_v5 = vld [vmem:[%s285_s0 + $0x8] sm:$0xf0]  ;;  %135 = vmatpush.bf16.msra.mxu1 %v207_v2  ;;  %v202_v11 = vld [vmem:[%s284_s1 + $0x18] sm:$0xff] }
   0x3   :  { %v159_v6 = vor.u32 %v197_v3, %v156_v5  ;;  %v35_v7 = vld [vmem:[%s286_s2] sm:$0xff]  ;;  %v204_v8 = vld [vmem:[%s284_s1 + $0x28] sm:$0xff]  ;;  %v201_v12 = vld [vmem:[%s284_s1 + $0x10] sm:$0xff] }
   0x4   :  { %39 = vperm.xlu0 %214, %v35_v7   ;;  %v203_v9 = vld [vmem:[%s284_s1 + $0x20] sm:$0xff]  ;;  %v36_v10 = vld [vmem:[%s286_s2 + $0x8] sm:$0xff] }
   0x5   :  { %196 = vmatmul.msk.bf16.vlgmr.msra.gmra.mxu1 %vm110_vm0, %v159_v6  ;;  %v200_v13 = vld [vmem:[%s284_s1 + $0x8] sm:$0xff]  ;;  %v199_v14 = vld [vmem:[%s284_s1] sm:$0xff] }
   0x6   :  { %115 = vmatpush.bf16.msra.mxu0 %v205_v1  ;;  %v154_v15 = vld [vmem:[%s285_s0] sm:$0xf]  ;;  %v198_v16 = vld [vmem:[%s285_s0 + $0x4] sm:$0xf0] }
   0x7   :  { %v155_v17 = vor.u32 %v198_v16, %v154_v15 }
   0xa   :  { %116 = vmatpush.bf16.msra.mxu0 %v204_v8 }
   0xc   :  { %44 = vperm.xlu0 %214, %v36_v10  }
   0xe   :  { %117 = vmatpush.bf16.msra.mxu0 %v203_v9 }
  0x12   :  { %118 = vmatpush.bf16.msra.mxu0 %v202_v11 }
  0x16   :  { %119 = vmatpush.bf16.msra.mxu0 %v201_v12 }
  0x1a   :  { %120 = vmatpush.bf16.msra.mxu0 %v200_v13 }
  0x1e   :  { %121 = vmatpush.bf16.msra.mxu0 %v199_v14 }
  0x21   :  { %122 = vmatmul.bf16.vlgmr.msra.gmra.mxu0 %v155_v17 }
  0x76   :  { %v40_v18 = vpop.permute.xlu0 %39 }
  0x7e   :  { %v45_v22 = vpop.permute.xlu0 %44 }
  0x82   :  { %v137_v19 = vpop.f32.mrf.mxu1 }
  0x8a   :  { %v139_v26 = vpop.f32.mrf.mxu1 }
  0x9e   :  { %v123_v20 = vpop.f32.mrf.mxu0 }
  0x9f   :  { %v124_v21 = vadd.f32 %v123_v20, %v40_v18 }
  0xa1   :  { %v138_v24 = vadd.f32 %v137_v19, %v124_v21 }
  0xa3   :  { %v142_v28 = vmax.f32 %v138_v24, 0.0 }
  0xa6   :  { %v125_v23 = vpop.f32.mrf.mxu0 }
  0xa7   :  { %v126_v25 = vadd.f32 %v125_v23, %v45_v22 }
  0xa9   :  { %v140_v27 = vadd.f32 %v139_v26, %v126_v25 }
  0xab   :  { %v143_v29 = vmax.f32 %v140_v27, 0.0 }
  0xad   :  { %v211_v30 = vpack.c.bf16 %v143_v29, %v142_v28 }
  0xaf   :  { %212 = vst [vmem:[%s287_s3] sm:$0xff] %v211_v30  }

// kernel: decoder_unet_forward.13
= control target key start
LH: loop header
LB: loop body
LE: loop exit
PB: predicated region body
PF: predicated region fallthrough
CT: control target
= control target key end

     0   :  { %v392_v0 = vmov 0   ;;  %vm175_vm0 = vcmask 130048   ;;  %s520_s2 = inlined_call_operand.vmem [shape: f32[128,1], index: 2, kind: input, shape index: {}]   ;;  %s521_s1 = inlined_call_operand.vmem [shape: bf16[16,128], index: 1, kind: input, shape index: {}]   ;;  %s522_s0 = inlined_call_operand.vmem [shape: bf16[128,16], index: 0, kind: input, shape index: {}]   ;;  %s523_s3 = inlined_call_operand.vmem [shape: bf16[128,128], index: 3, kind: output, shape index: {}]  }
   0x1   :  { %390 = vset.pattern.permute.xlu1 %v392_v0  ;;  %389 = vset.pattern.permute.xlu0 %v392_v0  ;;  %v35_v1 = vld [vmem:[%s520_s2 + $0x10] sm:$0xff]  ;;  %v33_v2 = vld [vmem:[%s520_s2] sm:$0xff]  ;;  %v36_v9 = vld [vmem:[%s520_s2 + $0x18] sm:$0xff] }
   0x2   :  { %v337_v3 = vld [vmem:[%s521_s1] sm:$0xff]  ;;  %61 = vperm.xlu1 %390, %v35_v1   ;;  %51 = vperm.xlu0 %389, %v33_v2   ;;  %v331_v5 = vld [vmem:[%s522_s0 + $0x10] sm:$0xff]  ;;  %v34_v10 = vld [vmem:[%s520_s2 + $0x8] sm:$0xff] }
   0x3   :  { %v329_v4 = vld [vmem:[%s522_s0] sm:$0xff]  ;;  %207 = vmatpush.bf16.msra.mxu0 %v337_v3  ;;  %385 = vmatpush.bf16.msra.mxu1 %v337_v3  ;;  %v335_v7 = vld [vmem:[%s522_s0 + $0x30] sm:$0xff]  ;;  %v38_v11 = vld [vmem:[%s520_s2 + $0x28] sm:$0xff] }
   0x4   :  { %v333_v6 = vld [vmem:[%s522_s0 + $0x20] sm:$0xff]  ;;  %386 = vmatpush.bf16.msra.mxu2 %v337_v3  ;;  %387 = vmatpush.bf16.msra.mxu3 %v337_v3  ;;  %v40_v12 = vld [vmem:[%s520_s2 + $0x38] sm:$0xff]  ;;  %v39_v13 = vld [vmem:[%s520_s2 + $0x30] sm:$0xff] }
   0x5   :  { %391 = vset.pattern.permute.xlu2 %v392_v0  ;;  %v37_v8 = vld [vmem:[%s520_s2 + $0x20] sm:$0xff]  ;;  %v330_v14 = vld [vmem:[%s522_s0 + $0x8] sm:$0xff]  ;;  %v332_v15 = vld [vmem:[%s522_s0 + $0x18] sm:$0xff] }
   0x6   :  { %321 = vmatmul.msk.bf16.vlgmr.msra.gmra.mxu0 %vm175_vm0, %v329_v4  ;;  %323 = vmatmul.msk.bf16.vlgmr.msra.gmra.mxu1 %vm175_vm0, %v331_v5  ;;  %v334_v16 = vld [vmem:[%s522_s0 + $0x28] sm:$0xff]  ;;  %v336_v17 = vld [vmem:[%s522_s0 + $0x38] sm:$0xff]  ;;  %v41_v18 = vld [vmem:[%s520_s2 + $0x40] sm:$0xff] }
   0x7   :  { %325 = vmatmul.msk.bf16.vlgmr.msra.gmra.mxu2 %vm175_vm0, %v333_v6  ;;  %327 = vmatmul.msk.bf16.vlgmr.msra.gmra.mxu3 %vm175_vm0, %v335_v7  ;;  %v43_v19 = vld [vmem:[%s520_s2 + $0x50] sm:$0xff]  ;;  %v42_v20 = vld [vmem:[%s520_s2 + $0x48] sm:$0xff]  ;;  %v44_v21 = vld [vmem:[%s520_s2 + $0x58] sm:$0xff] }
   0x8   :  { %71 = vperm.xlu2 %391, %v37_v8   ;;  %v46_v22 = vld [vmem:[%s520_s2 + $0x68] sm:$0xff]  ;;  %v45_v23 = vld [vmem:[%s520_s2 + $0x60] sm:$0xff]  ;;  %v47_v24 = vld [vmem:[%s520_s2 + $0x70] sm:$0xff] }
   0x9   :  { %v48_v25 = vld [vmem:[%s520_s2 + $0x78] sm:$0xff] }
   0xa   :  { %66 = vperm.xlu1 %390, %v36_v9   ;;  %56 = vperm.xlu0 %389, %v34_v10  }
  0x10   :  { %76 = vperm.xlu2 %391, %v38_v11  }
  0x12   :  { %86 = vperm.xlu1 %390, %v40_v12   ;;  %81 = vperm.xlu0 %389, %v39_v13  }
  0x16   :  { %322 = vmatmul.msk.bf16.gmra.mxu0 %vm175_vm0, %v330_v14  ;;  %324 = vmatmul.msk.bf16.gmra.mxu1 %vm175_vm0, %v332_v15 }
  0x17   :  { %326 = vmatmul.msk.bf16.gmra.mxu2 %vm175_vm0, %v334_v16  ;;  %328 = vmatmul.msk.bf16.gmra.mxu3 %vm175_vm0, %v336_v17 }
  0x18   :  { %91 = vperm.xlu2 %391, %v41_v18  }
  0x1a   :  { %101 = vperm.xlu1 %390, %v43_v19   ;;  %96 = vperm.xlu0 %389, %v42_v20  }
  0x20   :  { %106 = vperm.xlu2 %391, %v44_v21  }
  0x22   :  { %116 = vperm.xlu1 %390, %v46_v22   ;;  %111 = vperm.xlu0 %389, %v45_v23  }
  0x28   :  { %121 = vperm.xlu2 %391, %v47_v24  }
  0x2a   :  { %126 = vperm.xlu0 %389, %v48_v25  }
  0x62   :  { %v72_v28 = vpop.permute.xlu2 %71 }
  0x6a   :  { %v77_v31 = vpop.permute.xlu2 %76 }
  0x72   :  { %v92_v46 = vpop.permute.xlu2 %91 }
  0x74   :  { %v62_v26 = vpop.permute.xlu1 %61  ;;  %v52_v27 = vpop.permute.xlu0 %51 }
  0x7a   :  { %v107_v60 = vpop.permute.xlu2 %106 }
  0x7c   :  { %v67_v29 = vpop.permute.xlu1 %66  ;;  %v57_v30 = vpop.permute.xlu0 %56 }
  0x82   :  { %v122_v8 = vpop.permute.xlu2 %121 }
  0x83   :  { %v209_v32 = vpop.f32.mrf.mxu0  ;;  %v219_v33 = vpop.f32.mrf.mxu1 }
  0x84   :  { %v87_v34 = vpop.permute.xlu1 %86  ;;  %v82_v35 = vpop.permute.xlu0 %81  ;;  %v210_v40 = vadd.f32 %v209_v32, %v52_v27  ;;  %v220_v41 = vadd.f32 %v219_v33, %v72_v28 }
  0x8a   :  { %v229_v36 = vpop.f32.mrf.mxu2  ;;  %v239_v37 = vpop.f32.mrf.mxu3 }
  0x8b   :  { %v211_v38 = vpop.f32.mrf.mxu0  ;;  %v221_v39 = vpop.f32.mrf.mxu1  ;;  %v230_v51 = vadd.f32 %v229_v36, %v92_v46 }
  0x8c   :  { %v102_v42 = vpop.permute.xlu1 %101  ;;  %v97_v43 = vpop.permute.xlu0 %96  ;;  %v212_v44 = vadd.f32 %v211_v38, %v57_v30  ;;  %v222_v45 = vadd.f32 %v221_v39, %v77_v31 }
  0x8e   :  { %v341_v47 = vpack.c.bf16 %v212_v44, %v210_v40  ;;  %v351_v48 = vpack.c.bf16 %v222_v45, %v220_v41 }
  0x90   :  { %342 = vst [vmem:[%s523_s3] sm:$0xff] %v341_v47  }
  0x91   :  { %379 = vst [vmem:[%s523_s3 + $0x10] sm:$0xff] %v351_v48  }
  0x92   :  { %v231_v49 = vpop.f32.mrf.mxu2  ;;  %v241_v50 = vpop.f32.mrf.mxu3 }
  0x93   :  { %v232_v52 = vadd.f32 %v231_v49, %v97_v43  ;;  %v214_v53 = vpop.f32.mrf.mxu0  ;;  %v224_v54 = vpop.f32.mrf.mxu1 }
  0x94   :  { %v117_v55 = vpop.permute.xlu1 %116  ;;  %v112_v56 = vpop.permute.xlu0 %111  ;;  %v215_v2 = vadd.f32 %v214_v53, %v62_v26  ;;  %v225_v3 = vadd.f32 %v224_v54, %v82_v35 }
  0x95   :  { %v361_v57 = vpack.c.bf16 %v232_v52, %v230_v51  ;;  %v242_v58 = vadd.f32 %v241_v50, %v117_v55  ;;  %v240_v59 = vadd.f32 %v239_v37, %v112_v56 }
  0x97   :  { %381 = vst [vmem:[%s523_s3 + $0x20] sm:$0xff] %v361_v57   ;;  %v371_v61 = vpack.c.bf16 %v242_v58, %v240_v59 }
  0x99   :  { %383 = vst [vmem:[%s523_s3 + $0x30] sm:$0xff] %v371_v61  }
  0x9a   :  { %v234_v62 = vpop.f32.mrf.mxu2  ;;  %v244_v63 = vpop.f32.mrf.mxu3 }
  0x9b   :  { %v216_v0 = vpop.f32.mrf.mxu0  ;;  %v226_v1 = vpop.f32.mrf.mxu1  ;;  %v235_v12 = vadd.f32 %v234_v62, %v102_v42  ;;  %v245_v13 = vadd.f32 %v244_v63, %v122_v8 }
  0x9c   :  { %v217_v4 = vadd.f32 %v216_v0, %v67_v29  ;;  %v227_v5 = vadd.f32 %v226_v1, %v87_v34  ;;  %v127_v9 = vpop.permute.xlu0 %126 }
  0x9e   :  { %v346_v6 = vpack.c.bf16 %v217_v4, %v215_v2  ;;  %v356_v7 = vpack.c.bf16 %v227_v5, %v225_v3 }
  0xa0   :  { %378 = vst [vmem:[%s523_s3 + $0x8] sm:$0xff] %v346_v6  }
  0xa1   :  { %380 = vst [vmem:[%s523_s3 + $0x18] sm:$0xff] %v356_v7  }
  0xa2   :  { %v236_v10 = vpop.f32.mrf.mxu2  ;;  %v246_v11 = vpop.f32.mrf.mxu3 }
  0xa3   :  { %v237_v14 = vadd.f32 %v236_v10, %v107_v60  ;;  %v247_v15 = vadd.f32 %v246_v11, %v127_v9 }
  0xa5   :  { %v366_v16 = vpack.c.bf16 %v237_v14, %v235_v12  ;;  %v376_v17 = vpack.c.bf16 %v247_v15, %v245_v13 }
  0xa7   :  { %382 = vst [vmem:[%s523_s3 + $0x28] sm:$0xff] %v366_v16  }
  0xa8   :  { %384 = vst [vmem:[%s523_s3 + $0x38] sm:$0xff] %v376_v17  }

// kernel: decoder_unet_forward.14
= control target key start
LH: loop header
LB: loop body
LE: loop exit
PB: predicated region body
PF: predicated region fallthrough
CT: control target
= control target key end

     0   :  { %v550_v58 = vmov 0   ;;  %vm244_vm0 = vcmask 130048   ;;  %s813_s1 = inlined_call_operand.vmem [shape: bf16[144,512], index: 1, kind: input, shape index: {}]   ;;  %s814_s0 = inlined_call_operand.vmem [shape: bf16[8,144], index: 0, kind: input, shape index: {}]   ;;  %s815_s2 = inlined_call_operand.vmem [shape: f32[8,1], index: 2, kind: input, shape index: {}]   ;;  %s816_s3 = inlined_call_operand.vmem [shape: bf16[8,512], index: 3, kind: output, shape index: {}]  }
   0x1   :  { %v478_v0 = vld [vmem:[%s813_s1 + $0xe0] sm:$0xf]  ;;  %v542_v1 = vld [vmem:[%s813_s1 + $0xec] sm:$0xf0]  ;;  %v540_v2 = vld [vmem:[%s813_s1 + $0xe4] sm:$0xf]  ;;  %549 = vset.pattern.permute.xlu0 %v550_v58 }
   0x2   :  { %v479_v3 = vor.u32 %v542_v1, %v478_v0  ;;  %v480_v4 = vld [vmem:[%s813_s1 + $0xf0] sm:$0xf0]  ;;  %v494_v5 = vld [vmem:[%s813_s1 + $0x100] sm:$0xf]  ;;  %v546_v6 = vld [vmem:[%s813_s1 + $0x10c] sm:$0xf0] }
   0x3   :  { %v483_v7 = vor.u32 %v540_v2, %v480_v4  ;;  %v495_v8 = vor.u32 %v546_v6, %v494_v5  ;;  %v486_v9 = vld [vmem:[%s813_s1 + $0xe8] sm:$0xf]  ;;  %v543_v10 = vld [vmem:[%s813_s1 + $0xf4] sm:$0xf0]  ;;  %v462_v11 = vld [vmem:[%s813_s1 + $0xc0] sm:$0xf] }
   0x4   :  { %248 = vmatpush.bf16.msra.mxu0 %v479_v3  ;;  %v487_v12 = vor.u32 %v543_v10, %v486_v9  ;;  %v538_v13 = vld [vmem:[%s813_s1 + $0xcc] sm:$0xf0]  ;;  %v536_v14 = vld [vmem:[%s813_s1 + $0xc4] sm:$0xf]  ;;  %v464_v15 = vld [vmem:[%s813_s1 + $0xd0] sm:$0xf0] }
   0x5   :  { %274 = vmatpush.bf16.msra.mxu2 %v483_v7  ;;  %268 = vmatpush.bf16.msra.mxu1 %v495_v8  ;;  %v463_v16 = vor.u32 %v538_v13, %v462_v11  ;;  %v467_v17 = vor.u32 %v536_v14, %v464_v15  ;;  %v502_v18 = vld [vmem:[%s813_s1 + $0x108] sm:$0xf]  ;;  %v547_v19 = vld [vmem:[%s813_s1 + $0x114] sm:$0xf0]  ;;  %v541_v23 = vld [vmem:[%s813_s1 + $0xec] sm:$0xf] }
   0x6   :  { %v470_v20 = vld [vmem:[%s813_s1 + $0xc8] sm:$0xf]  ;;  %v503_v21 = vor.u32 %v547_v19, %v502_v18  ;;  %v539_v22 = vld [vmem:[%s813_s1 + $0xd4] sm:$0xf0]  ;;  %v488_v24 = vld [vmem:[%s813_s1 + $0xf8] sm:$0xf0] }
   0x7   :  { %v471_v25 = vor.u32 %v539_v22, %v470_v20  ;;  %v491_v26 = vor.u32 %v541_v23, %v488_v24  ;;  %v446_v27 = vld [vmem:[%s813_s1 + $0xa0] sm:$0xf]  ;;  %v534_v28 = vld [vmem:[%s813_s1 + $0xac] sm:$0xf0]  ;;  %v532_v29 = vld [vmem:[%s813_s1 + $0xa4] sm:$0xf] }
   0x8   :  { %249 = vmatpush.bf16.msra.mxu0 %v463_v16  ;;  %320 = vmatpush.bf16.msra.mxu3 %v503_v21  ;;  %v447_v30 = vor.u32 %v534_v28, %v446_v27  ;;  %v448_v31 = vld [vmem:[%s813_s1 + $0xb0] sm:$0xf0]  ;;  %v454_v32 = vld [vmem:[%s813_s1 + $0xa8] sm:$0xf]  ;;  %v535_v33 = vld [vmem:[%s813_s1 + $0xb4] sm:$0xf0] }
   0x9   :  { %300 = vmatpush.bf16.msrb.mxu1 %v487_v12  ;;  %275 = vmatpush.bf16.msra.mxu2 %v467_v17  ;;  %v451_v34 = vor.u32 %v532_v29, %v448_v31  ;;  %v537_v35 = vld [vmem:[%s813_s1 + $0xcc] sm:$0xf]  ;;  %v472_v36 = vld [vmem:[%s813_s1 + $0xd8] sm:$0xf0]  ;;  %v430_v37 = vld [vmem:[%s813_s1 + $0x80] sm:$0xf]  ;;  %v455_v38 = vor.u32 %v535_v33, %v454_v32 }
   0xa   :  { %v475_v39 = vor.u32 %v537_v35, %v472_v36  ;;  %v530_v40 = vld [vmem:[%s813_s1 + $0x8c] sm:$0xf0]  ;;  %v528_v41 = vld [vmem:[%s813_s1 + $0x84] sm:$0xf]  ;;  %v432_v42 = vld [vmem:[%s813_s1 + $0x90] sm:$0xf0] }
   0xb   :  { %v438_v43 = vld [vmem:[%s813_s1 + $0x88] sm:$0xf]  ;;  %v531_v44 = vld [vmem:[%s813_s1 + $0x94] sm:$0xf0]  ;;  %v533_v45 = vld [vmem:[%s813_s1 + $0xac] sm:$0xf]  ;;  %v431_v46 = vor.u32 %v530_v40, %v430_v37  ;;  %v435_v48 = vor.u32 %v528_v41, %v432_v42 }
   0xc   :  { %326 = vmatpush.bf16.msrb.mxu3 %v491_v26  ;;  %250 = vmatpush.bf16.msra.mxu0 %v447_v30  ;;  %v456_v47 = vld [vmem:[%s813_s1 + $0xb8] sm:$0xf0]  ;;  %v414_v50 = vld [vmem:[%s813_s1 + $0x60] sm:$0xf]  ;;  %v526_v51 = vld [vmem:[%s813_s1 + $0x6c] sm:$0xf0]  ;;  %v439_v53 = vor.u32 %v531_v44, %v438_v43 }
   0xd   :  { %301 = vmatpush.bf16.msrb.mxu1 %v471_v25  ;;  %276 = vmatpush.bf16.msra.mxu2 %v451_v34  ;;  %v459_v49 = vor.u32 %v533_v45, %v456_v47  ;;  %v682_v52 = vld [vmem:[%s814_s0] sm:$0xff]  ;;  %v416_v55 = vld [vmem:[%s813_s1 + $0x70] sm:$0xf0]  ;;  %v529_v57 = vld [vmem:[%s813_s1 + $0x8c] sm:$0xf]  ;;  %v415_v62 = vor.u32 %v526_v51, %v414_v50 }
   0xe   :  { %v524_v54 = vld [vmem:[%s813_s1 + $0x64] sm:$0xf]  ;;  %v60_v56 = vunpack.c.h.b16 %v682_v52  ;;  %v422_v59 = vld [vmem:[%s813_s1 + $0x68] sm:$0xf]  ;;  %v527_v60 = vld [vmem:[%s813_s1 + $0x74] sm:$0xf0]  ;;  %v59_v35 = vunpack.c.l.b16 %v682_v52 }
   0xf   :  { %v440_v61 = vld [vmem:[%s813_s1 + $0x98] sm:$0xf0]  ;;  %v419_v0 = vor.u32 %v524_v54, %v416_v55  ;;  %v398_v2 = vld [vmem:[%s813_s1 + $0x40] sm:$0xf]  ;;  %v522_v3 = vld [vmem:[%s813_s1 + $0x4c] sm:$0xf0]  ;;  %v423_v5 = vor.u32 %v527_v60, %v422_v59 }
  0x10   :  { %327 = vmatpush.bf16.msrb.mxu3 %v475_v39  ;;  %251 = vmatpush.bf16.msra.mxu0 %v431_v46  ;;  %v703_v63 = vpack.c.b16 %v60_v56, %v60_v56  ;;  %v443_v1 = vor.u32 %v529_v57, %v440_v61  ;;  %v520_v4 = vld [vmem:[%s813_s1 + $0x44] sm:$0xf]  ;;  %v400_v6 = vld [vmem:[%s813_s1 + $0x50] sm:$0xf0]  ;;  %v525_v7 = vld [vmem:[%s813_s1 + $0x6c] sm:$0xf]  ;;  %v399_v11 = vor.u32 %v522_v3, %v398_v2 }
  0x11   :  { %302 = vmatpush.bf16.msrb.mxu1 %v455_v38  ;;  %277 = vmatpush.bf16.msra.mxu2 %v435_v48  ;;  %v424_v8 = vld [vmem:[%s813_s1 + $0x78] sm:$0xf0]  ;;  %v406_v9 = vld [vmem:[%s813_s1 + $0x48] sm:$0xf]  ;;  %v523_v10 = vld [vmem:[%s813_s1 + $0x54] sm:$0xf0]  ;;  %v403_v12 = vor.u32 %v520_v4, %v400_v6  ;;  %v61_v48 = vpack.c.b16 %v59_v35, %v59_v35 }
  0x12   :  { %510 = vmatmul.msk.bf16.vlgmr.msra.gmra.mxu3 %vm244_vm0, %v703_v63  ;;  %508 = vmatmul.msk.bf16.vlgmr.msra.gmra.mxu1 %vm244_vm0, %v703_v63  ;;  %v427_v13 = vor.u32 %v525_v7, %v424_v8  ;;  %v382_v14 = vld [vmem:[%s813_s1 + $0x20] sm:$0xf]  ;;  %v518_v15 = vld [vmem:[%s813_s1 + $0x2c] sm:$0xf0]  ;;  %v516_v16 = vld [vmem:[%s813_s1 + $0x24] sm:$0xf]  ;;  %v407_v17 = vor.u32 %v523_v10, %v406_v9 }
  0x13   :  { %v384_v18 = vld [vmem:[%s813_s1 + $0x30] sm:$0xf0]  ;;  %v521_v19 = vld [vmem:[%s813_s1 + $0x4c] sm:$0xf]  ;;  %v408_v20 = vld [vmem:[%s813_s1 + $0x58] sm:$0xf0]  ;;  %v383_v23 = vor.u32 %v518_v15, %v382_v14 }
  0x14   :  { %328 = vmatpush.bf16.msrb.mxu3 %v459_v49  ;;  %252 = vmatpush.bf16.msra.mxu0 %v415_v62  ;;  %v390_v21 = vld [vmem:[%s813_s1 + $0x28] sm:$0xf]  ;;  %v519_v22 = vld [vmem:[%s813_s1 + $0x34] sm:$0xf0]  ;;  %v366_v24 = vld [vmem:[%s813_s1] sm:$0xf]  ;;  %v387_v26 = vor.u32 %v516_v16, %v384_v18  ;;  %v411_v27 = vor.u32 %v521_v19, %v408_v20 }
  0x15   :  { %303 = vmatpush.bf16.msrb.mxu1 %v439_v53  ;;  %278 = vmatpush.bf16.msra.mxu2 %v419_v0  ;;  %v514_v25 = vld [vmem:[%s813_s1 + $0xc] sm:$0xf0]  ;;  %v512_v28 = vld [vmem:[%s813_s1 + $0x4] sm:$0xf]  ;;  %v368_v29 = vld [vmem:[%s813_s1 + $0x10] sm:$0xf0]  ;;  %v391_v31 = vor.u32 %v519_v22, %v390_v21 }
  0x16   :  { %v52_v30 = vld [vmem:[%s815_s2] sm:$0xff]  ;;  %v517_v33 = vld [vmem:[%s813_s1 + $0x2c] sm:$0xf]  ;;  %v392_v34 = vld [vmem:[%s813_s1 + $0x38] sm:$0xf0]  ;;  %v367_v39 = vor.u32 %v514_v25, %v366_v24  ;;  %v371_v40 = vor.u32 %v512_v28, %v368_v29 }
  0x17   :  { %v544_v32 = vld [vmem:[%s813_s1 + $0x104] sm:$0xf]  ;;  %55 = vperm.xlu0 %549, %v52_v30   ;;  %v496_v36 = vld [vmem:[%s813_s1 + $0x110] sm:$0xf0]  ;;  %v374_v37 = vld [vmem:[%s813_s1 + $0x8] sm:$0xf]  ;;  %v395_v41 = vor.u32 %v517_v33, %v392_v34 }
  0x18   :  { %329 = vmatpush.bf16.msrb.mxu3 %v443_v1  ;;  %253 = vmatpush.bf16.msra.mxu0 %v399_v11  ;;  %v515_v38 = vld [vmem:[%s813_s1 + $0x14] sm:$0xf0]  ;;  %v545_v42 = vld [vmem:[%s813_s1 + $0x10c] sm:$0xf]  ;;  %v504_v43 = vld [vmem:[%s813_s1 + $0x118] sm:$0xf0]  ;;  %v499_v44 = vor.u32 %v544_v32, %v496_v36 }
  0x19   :  { %304 = vmatpush.bf16.msrb.mxu1 %v423_v5  ;;  %279 = vmatpush.bf16.msra.mxu2 %v403_v12  ;;  %v375_v45 = vor.u32 %v515_v38, %v374_v37  ;;  %v513_v46 = vld [vmem:[%s813_s1 + $0xc] sm:$0xf]  ;;  %v376_v47 = vld [vmem:[%s813_s1 + $0x18] sm:$0xf0]  ;;  %v507_v49 = vor.u32 %v545_v42, %v504_v43 }
  0x1a   :  { %v379_v50 = vor.u32 %v513_v46, %v376_v47 }
  0x1c   :  { %330 = vmatpush.bf16.msrb.mxu3 %v427_v13  ;;  %254 = vmatpush.bf16.msra.mxu0 %v383_v23 }
  0x1d   :  { %305 = vmatpush.bf16.msrb.mxu1 %v407_v17  ;;  %280 = vmatpush.bf16.msra.mxu2 %v387_v26 }
  0x20   :  { %331 = vmatpush.bf16.msrb.mxu3 %v411_v27  ;;  %255 = vmatpush.bf16.msra.mxu0 %v367_v39 }
  0x21   :  { %306 = vmatpush.bf16.msrb.mxu1 %v391_v31  ;;  %281 = vmatpush.bf16.msra.mxu2 %v371_v40 }
  0x23   :  { %256 = vmatmul.bf16.vlgmr.msra.gmra.mxu0 %v61_v48 }
  0x24   :  { %332 = vmatpush.bf16.msrb.mxu3 %v395_v41  ;;  %282 = vmatmul.bf16.vlgmr.msra.gmra.mxu2 %v61_v48 }
  0x25   :  { %294 = vmatpush.bf16.msrb.mxu2 %v499_v44  ;;  %307 = vmatpush.bf16.msrb.mxu1 %v375_v45 }
  0x26   :  { %346 = vmatpush.bf16.msrb.mxu0 %v507_v49 }
  0x28   :  { %308 = vmatmul.bf16.vlgmr.msrb.gmra.mxu1 %v61_v48  ;;  %333 = vmatpush.bf16.msrb.mxu3 %v379_v50 }
  0x2b   :  { %334 = vmatmul.bf16.vlgmr.msrb.gmra.mxu3 %v61_v48 }
  0x33   :  { %511 = vmatmul.msk.bf16.vlgmr.msrb.gmra.mxu0 %vm244_vm0, %v703_v63 }
  0x34   :  { %509 = vmatmul.msk.bf16.vlgmr.msrb.gmra.mxu2 %vm244_vm0, %v703_v63 }
  0x89   :  { %v56_v58 = vpop.permute.xlu0 %55 }
  0x8f   :  { %v270_v51 = vpop.f32.mrf.mxu1 }
  0x95   :  { %v322_v52 = vpop.f32.mrf.mxu3 }
  0x97   :  { %v272_v53 = vpop.f32.mrf.mxu1 }
  0x9d   :  { %v324_v54 = vpop.f32.mrf.mxu3 }
  0xa0   :  { %v257_v55 = vpop.f32.mrf.mxu0 }
  0xa1   :  { %v258_v5 = vadd.f32 %v257_v55, %v56_v58 }
  0xa3   :  { %v271_v10 = vadd.f32 %v270_v51, %v258_v5 }
  0xa5   :  { %v309_v56 = vpop.f32.mrf.mxu1  ;;  %v352_v14 = vmax.f32 %v271_v10, 0.0 }
  0xa6   :  { %v310_v61 = vadd.f32 %v309_v56, %v56_v58 }
  0xa7   :  { %v283_v57 = vpop.f32.mrf.mxu2 }
  0xa8   :  { %v259_v59 = vpop.f32.mrf.mxu0  ;;  %v323_v1 = vadd.f32 %v322_v52, %v310_v61  ;;  %v284_v9 = vadd.f32 %v283_v57, %v56_v58 }
  0xaa   :  { %v354_v6 = vmax.f32 %v323_v1, 0.0 }
  0xad   :  { %v311_v60 = vpop.f32.mrf.mxu1 }
  0xae   :  { %v335_v62 = vpop.f32.mrf.mxu3 }
  0xaf   :  { %v336_v0 = vadd.f32 %v335_v62, %v56_v58  ;;  %v285_v2 = vpop.f32.mrf.mxu2 }
  0xb0   :  { %v348_v3 = vpop.f32.mrf.mxu0 }
  0xb1   :  { %v349_v4 = vadd.f32 %v348_v3, %v336_v0 }
  0xb3   :  { %v355_v63 = vmax.f32 %v349_v4, 0.0 }
  0xb5   :  { %v357_v8 = vpack.c.bf16 %v355_v63, %v354_v6 }
  0xb6   :  { %v337_v7 = vpop.f32.mrf.mxu3 }
  0xb7   :  { %359 = vst [vmem:[%s816_s3 + $0x8] sm:$0xff] %v357_v8  ;;  %v296_v11 = vpop.f32.mrf.mxu2 }
  0xb8   :  { %v297_v12 = vadd.f32 %v296_v11, %v284_v9  ;;  %v350_v13 = vpop.f32.mrf.mxu0 }
  0xba   :  { %v353_v15 = vmax.f32 %v297_v12, 0.0 }
  0xbc   :  { %v356_v16 = vpack.c.bf16 %v353_v15, %v352_v14 }
  0xbe   :  { %358 = vst [vmem:[%s816_s3] sm:$0xff] %v356_v16 }
  0xbf   :  { %v298_v17 = vpop.f32.mrf.mxu2 }

// kernel: decoder_unet_forward.15
= control target key start
LH: loop header
LB: loop body
LE: loop exit
PB: predicated region body
PF: predicated region fallthrough
CT: control target
= control target key end

     0   :  { %v297_v2 = vmov 0   ;;  %vm134_vm0 = vcmask 1043456   ;;  %vm130_vm1 = vcmask 588800   ;;  %s436_s1 = inlined_call_operand.vmem [shape: bf16[72,512], index: 1, kind: input, shape index: {}]   ;;  %s437_s2 = inlined_call_operand.vmem [shape: f32[8,1], index: 2, kind: input, shape index: {}]   ;;  %s438_s0 = inlined_call_operand.vmem [shape: bf16[8,72], index: 0, kind: input, shape index: {}]   ;;  %s439_s3 = inlined_call_operand.vmem [shape: bf16[8,512], index: 3, kind: output, shape index: {}]  }
   0x1   :  { %v32_v0 = vld [vmem:[%s436_s1 + $0x80] sm:$0xff]  ;;  %v33_v1 = vld [vmem:[%s436_s1 + $0x88] sm:$0xff]  ;;  %296 = vset.pattern.permute.xlu0 %v297_v2  ;;  %v293_v8 = vld [vmem:[%s436_s1 + $0x6c] sm:$0xf0] }
   0x2   :  { %v90_v3 = vunpack.c.l.b16 %v32_v0  ;;  %v91_v4 = vunpack.c.h.b16 %v32_v0  ;;  %v92_v5 = vunpack.c.l.b16 %v33_v1  ;;  %v93_v6 = vunpack.c.h.b16 %v33_v1  ;;  %v261_v7 = vld [vmem:[%s436_s1 + $0x60] sm:$0xf]  ;;  %v291_v13 = vld [vmem:[%s436_s1 + $0x64] sm:$0xf]  ;;  %v263_v14 = vld [vmem:[%s436_s1 + $0x70] sm:$0xf0] }
   0x3   :  { %v269_v15 = vld [vmem:[%s436_s1 + $0x68] sm:$0xf]  ;;  %v294_v16 = vld [vmem:[%s436_s1 + $0x74] sm:$0xf0]  ;;  %v292_v17 = vld [vmem:[%s436_s1 + $0x6c] sm:$0xf]  ;;  %v262_v23 = vor.u32 %v293_v8, %v261_v7  ;;  %v266_v24 = vor.u32 %v291_v13, %v263_v14 }
   0x4   :  { %v110_v9 = vpack.c.b16 %v90_v3, %v90_v3  ;;  %v111_v10 = vpack.c.b16 %v91_v4, %v91_v4  ;;  %v112_v11 = vpack.c.b16 %v92_v5, %v92_v5  ;;  %v113_v12 = vpack.c.b16 %v93_v6, %v93_v6  ;;  %v271_v18 = vld [vmem:[%s436_s1 + $0x78] sm:$0xf0]  ;;  %v245_v25 = vld [vmem:[%s436_s1 + $0x40] sm:$0xf]  ;;  %v289_v26 = vld [vmem:[%s436_s1 + $0x4c] sm:$0xf0] }
   0x5   :  { %v270_v27 = vor.u32 %v294_v16, %v269_v15  ;;  %v274_v28 = vor.u32 %v292_v17, %v271_v18  ;;  %v287_v29 = vld [vmem:[%s436_s1 + $0x44] sm:$0xf]  ;;  %v247_v30 = vld [vmem:[%s436_s1 + $0x50] sm:$0xf0]  ;;  %v253_v31 = vld [vmem:[%s436_s1 + $0x48] sm:$0xf]  ;;  %v246_v35 = vor.u32 %v289_v26, %v245_v25 }
   0x6   :  { %v136_v19 = vsel %vm134_vm0, %v110_v9, 0  ;;  %v139_v20 = vsel %vm134_vm0, %v111_v10, 0  ;;  %v142_v21 = vsel %vm134_vm0, %v112_v11, 0  ;;  %v145_v22 = vsel %vm134_vm0, %v113_v12, 0  ;;  %v290_v32 = vld [vmem:[%s436_s1 + $0x54] sm:$0xf0] }
   0x7   :  { %150 = vmatpush.bf16.msra.mxu0 %v136_v19  ;;  %163 = vmatpush.bf16.msra.mxu1 %v139_v20  ;;  %v288_v33 = vld [vmem:[%s436_s1 + $0x4c] sm:$0xf]  ;;  %v255_v34 = vld [vmem:[%s436_s1 + $0x58] sm:$0xf0]  ;;  %v250_v36 = vor.u32 %v287_v29, %v247_v30  ;;  %v229_v37 = vld [vmem:[%s436_s1 + $0x20] sm:$0xf]  ;;  %v254_v40 = vor.u32 %v290_v32, %v253_v31 }
   0x8   :  { %176 = vmatpush.bf16.msra.mxu2 %v142_v21  ;;  %189 = vmatpush.bf16.msra.mxu3 %v145_v22  ;;  %v285_v38 = vld [vmem:[%s436_s1 + $0x2c] sm:$0xf0]  ;;  %v283_v39 = vld [vmem:[%s436_s1 + $0x24] sm:$0xf]  ;;  %v258_v41 = vor.u32 %v288_v33, %v255_v34  ;;  %v231_v42 = vld [vmem:[%s436_s1 + $0x30] sm:$0xf0] }
   0x9   :  { %v237_v43 = vld [vmem:[%s436_s1 + $0x28] sm:$0xf]  ;;  %v286_v44 = vld [vmem:[%s436_s1 + $0x34] sm:$0xf0]  ;;  %v284_v45 = vld [vmem:[%s436_s1 + $0x2c] sm:$0xf]  ;;  %v230_v48 = vor.u32 %v285_v38, %v229_v37  ;;  %v234_v49 = vor.u32 %v283_v39, %v231_v42 }
   0xa   :  { %v239_v46 = vld [vmem:[%s436_s1 + $0x38] sm:$0xf0]  ;;  %v34_v47 = vld [vmem:[%s437_s2] sm:$0xff]  ;;  %v281_v51 = vld [vmem:[%s436_s1 + $0xc] sm:$0xf0]  ;;  %v238_v52 = vor.u32 %v286_v44, %v237_v43 }
   0xb   :  { %151 = vmatpush.bf16.msra.mxu0 %v262_v23  ;;  %164 = vmatpush.bf16.msra.mxu1 %v266_v24  ;;  %v213_v50 = vld [vmem:[%s436_s1] sm:$0xf]  ;;  %v242_v53 = vor.u32 %v284_v45, %v239_v46  ;;  %v279_v54 = vld [vmem:[%s436_s1 + $0x4] sm:$0xf]  ;;  %v215_v55 = vld [vmem:[%s436_s1 + $0x10] sm:$0xf0] }
   0xc   :  { %177 = vmatpush.bf16.msra.mxu2 %v270_v27  ;;  %190 = vmatpush.bf16.msra.mxu3 %v274_v28  ;;  %v221_v56 = vld [vmem:[%s436_s1 + $0x8] sm:$0xf]  ;;  %v282_v57 = vld [vmem:[%s436_s1 + $0x14] sm:$0xf0]  ;;  %v280_v58 = vld [vmem:[%s436_s1 + $0xc] sm:$0xf]  ;;  %v214_v60 = vor.u32 %v281_v51, %v213_v50  ;;  %v218_v61 = vor.u32 %v279_v54, %v215_v55 }
   0xd   :  { %37 = vperm.xlu0 %296, %v34_v47   ;;  %v223_v59 = vld [vmem:[%s436_s1 + $0x18] sm:$0xf0]  ;;  %v222_v62 = vor.u32 %v282_v57, %v221_v56  ;;  %v15_v0 = vld [vmem:[%s438_s0] sm:$0xf] }
   0xe   :  { %v226_v63 = vor.u32 %v280_v58, %v223_v59 }
   0xf   :  { %152 = vmatpush.bf16.msra.mxu0 %v246_v35  ;;  %165 = vmatpush.bf16.msra.mxu1 %v250_v36 }
  0x10   :  { %178 = vmatpush.bf16.msra.mxu2 %v254_v40  ;;  %191 = vmatpush.bf16.msra.mxu3 %v258_v41 }
  0x13   :  { %153 = vmatpush.bf16.msra.mxu0 %v230_v48  ;;  %166 = vmatpush.bf16.msra.mxu1 %v234_v49 }
  0x14   :  { %179 = vmatpush.bf16.msra.mxu2 %v238_v52  ;;  %192 = vmatpush.bf16.msra.mxu3 %v242_v53 }
  0x17   :  { %154 = vmatpush.bf16.msra.mxu0 %v214_v60  ;;  %167 = vmatpush.bf16.msra.mxu1 %v218_v61 }
  0x18   :  { %180 = vmatpush.bf16.msra.mxu2 %v222_v62  ;;  %193 = vmatpush.bf16.msra.mxu3 %v226_v63 }
  0x1a   :  { %275 = vmatmul.msk.bf16.vlgmr.msra.gmra.mxu0 %vm130_vm1, %v15_v0  ;;  %276 = vmatmul.msk.bf16.vlgmr.msra.gmra.mxu1 %vm130_vm1, %v15_v0 }
  0x1b   :  { %277 = vmatmul.msk.bf16.vlgmr.msra.gmra.mxu2 %vm130_vm1, %v15_v0  ;;  %278 = vmatmul.msk.bf16.vlgmr.msra.gmra.mxu3 %vm130_vm1, %v15_v0 }
  0x7f   :  { %v38_v1 = vpop.permute.xlu0 %37 }
  0x97   :  { %v156_v2 = vpop.f32.mrf.mxu0  ;;  %v169_v3 = vpop.f32.mrf.mxu1 }
  0x98   :  { %v157_v4 = vadd.f32 %v156_v2, %v38_v1  ;;  %v170_v5 = vadd.f32 %v169_v3, %v38_v1 }
  0x9a   :  { %v199_v6 = vmax.f32 %v157_v4, 0.0  ;;  %v200_v7 = vmax.f32 %v170_v5, 0.0 }
  0x9c   :  { %v203_v8 = vpack.c.bf16 %v200_v7, %v199_v6 }
  0x9e   :  { %v182_v9 = vpop.f32.mrf.mxu2  ;;  %v195_v10 = vpop.f32.mrf.mxu3  ;;  %205 = vst [vmem:[%s439_s3] sm:$0xff] %v203_v8 }
  0x9f   :  { %v183_v11 = vadd.f32 %v182_v9, %v38_v1  ;;  %v196_v12 = vadd.f32 %v195_v10, %v38_v1  ;;  %v158_v13 = vpop.f32.mrf.mxu0  ;;  %v171_v14 = vpop.f32.mrf.mxu1 }
  0xa1   :  { %v201_v15 = vmax.f32 %v183_v11, 0.0  ;;  %v202_v16 = vmax.f32 %v196_v12, 0.0 }
  0xa3   :  { %v204_v17 = vpack.c.bf16 %v202_v16, %v201_v15 }
  0xa5   :  { %206 = vst [vmem:[%s439_s3 + $0x8] sm:$0xff] %v204_v17 }
  0xa6   :  { %v184_v18 = vpop.f32.mrf.mxu2  ;;  %v197_v19 = vpop.f32.mrf.mxu3 }

// kernel: decoder_unet_forward.16
= control target key start
LH: loop header
LB: loop body
LE: loop exit
PB: predicated region body
PF: predicated region fallthrough
CT: control target
= control target key end

     0   :  { %v321_v2 = vmov 0   ;;  %vm116_vm0 = vcmask 1043456   ;;  %vm103_vm1 = vcmask 64512   ;;  %s448_s1 = inlined_call_operand.vmem [shape: bf16[8,512], index: 1, kind: input, shape index: {}]   ;;  %s449_s2 = inlined_call_operand.vmem [shape: f32[64,1], index: 2, kind: input, shape index: {}]   ;;  %s450_s0 = inlined_call_operand.vmem [shape: bf16[64,8], index: 0, kind: input, shape index: {}]   ;;  %s451_s3 = inlined_call_operand.vmem [shape: bf16[64,512], index: 3, kind: output, shape index: {}]  }
   0x1   :  { %v23_v0 = vld [vmem:[%s448_s1] sm:$0xff]  ;;  %v24_v1 = vld [vmem:[%s448_s1 + $0x8] sm:$0xff]  ;;  %318 = vset.pattern.permute.xlu0 %v321_v2  ;;  %319 = vset.pattern.permute.xlu1 %v321_v2  ;;  %v27_v8 = vld [vmem:[%s449_s2 + $0x10] sm:$0xff] }
   0x2   :  { %v95_v3 = vunpack.c.l.b16 %v23_v0  ;;  %v96_v4 = vunpack.c.h.b16 %v23_v0  ;;  %v97_v5 = vunpack.c.l.b16 %v24_v1  ;;  %v98_v6 = vunpack.c.h.b16 %v24_v1  ;;  %v25_v7 = vld [vmem:[%s449_s2] sm:$0xff]  ;;  %320 = vset.pattern.permute.xlu2 %v321_v2  ;;  %45 = vperm.xlu1 %319, %v27_v8   ;;  %v26_v18 = vld [vmem:[%s449_s2 + $0x8] sm:$0xff]  ;;  %v28_v19 = vld [vmem:[%s449_s2 + $0x18] sm:$0xff] }
   0x3   :  { %35 = vperm.xlu0 %318, %v25_v7   ;;  %v313_v17 = vld [vmem:[%s450_s0] sm:$0xff]  ;;  %v314_v20 = vld [vmem:[%s450_s0 + $0x8] sm:$0xff]  ;;  %v32_v21 = vld [vmem:[%s449_s2 + $0x38] sm:$0xff] }
   0x4   :  { %v99_v9 = vpack.c.b16 %v95_v3, %v95_v3  ;;  %v100_v10 = vpack.c.b16 %v96_v4, %v96_v4  ;;  %v101_v11 = vpack.c.b16 %v97_v5, %v97_v5  ;;  %v102_v12 = vpack.c.b16 %v98_v6, %v98_v6  ;;  %v31_v22 = vld [vmem:[%s449_s2 + $0x30] sm:$0xff]  ;;  %v29_v23 = vld [vmem:[%s449_s2 + $0x20] sm:$0xff]  ;;  %v30_v24 = vld [vmem:[%s449_s2 + $0x28] sm:$0xff] }
   0x5   :  { %55 = vperm.xlu2 %320, %v29_v23   ;;  %v315_v25 = vld [vmem:[%s450_s0 + $0x10] sm:$0xff]  ;;  %v316_v26 = vld [vmem:[%s450_s0 + $0x18] sm:$0xff] }
   0x6   :  { %v118_v13 = vsel %vm116_vm0, %v99_v9, 0  ;;  %v121_v14 = vsel %vm116_vm0, %v100_v10, 0  ;;  %v124_v15 = vsel %vm116_vm0, %v101_v11, 0  ;;  %v127_v16 = vsel %vm116_vm0, %v102_v12, 0 }
   0x7   :  { %136 = vmatpush.bf16.msra.mxu0 %v118_v13  ;;  %165 = vmatpush.bf16.msra.mxu1 %v121_v14 }
   0x8   :  { %194 = vmatpush.bf16.msra.mxu2 %v124_v15  ;;  %223 = vmatpush.bf16.msra.mxu3 %v127_v16 }
   0xa   :  { %297 = vmatmul.msk.bf16.vlgmr.msra.gmra.mxu0 %vm103_vm1, %v313_v17  ;;  %301 = vmatmul.msk.bf16.vlgmr.msra.gmra.mxu1 %vm103_vm1, %v313_v17 }
   0xb   :  { %305 = vmatmul.msk.bf16.vlgmr.msra.gmra.mxu2 %vm103_vm1, %v313_v17  ;;  %309 = vmatmul.msk.bf16.vlgmr.msra.gmra.mxu3 %vm103_vm1, %v313_v17 }
   0xc   :  { %40 = vperm.xlu0 %318, %v26_v18   ;;  %50 = vperm.xlu1 %319, %v28_v19  }
   0xd   :  { %60 = vperm.xlu2 %320, %v30_v24  }
  0x14   :  { %70 = vperm.xlu1 %319, %v32_v21   ;;  %65 = vperm.xlu0 %318, %v31_v22  }
  0x1a   :  { %298 = vmatmul.msk.bf16.gmra.mxu0 %vm103_vm1, %v314_v20  ;;  %302 = vmatmul.msk.bf16.gmra.mxu1 %vm103_vm1, %v314_v20 }
  0x1b   :  { %306 = vmatmul.msk.bf16.gmra.mxu2 %vm103_vm1, %v314_v20  ;;  %310 = vmatmul.msk.bf16.gmra.mxu3 %vm103_vm1, %v314_v20 }
  0x2a   :  { %299 = vmatmul.msk.bf16.gmra.mxu0 %vm103_vm1, %v315_v25  ;;  %303 = vmatmul.msk.bf16.gmra.mxu1 %vm103_vm1, %v315_v25 }
  0x2b   :  { %307 = vmatmul.msk.bf16.gmra.mxu2 %vm103_vm1, %v315_v25  ;;  %311 = vmatmul.msk.bf16.gmra.mxu3 %vm103_vm1, %v315_v25 }
  0x3a   :  { %300 = vmatmul.msk.bf16.gmra.mxu0 %vm103_vm1, %v316_v26  ;;  %304 = vmatmul.msk.bf16.gmra.mxu1 %vm103_vm1, %v316_v26 }
  0x3b   :  { %308 = vmatmul.msk.bf16.gmra.mxu2 %vm103_vm1, %v316_v26  ;;  %312 = vmatmul.msk.bf16.gmra.mxu3 %vm103_vm1, %v316_v26 }
  0x5f   :  { %v56_v2 = vpop.permute.xlu2 %55 }
  0x67   :  { %v61_v13 = vpop.permute.xlu2 %60 }
  0x74   :  { %v46_v44 = vpop.permute.xlu1 %45 }
  0x75   :  { %v36_v27 = vpop.permute.xlu0 %35 }
  0x7e   :  { %v41_v33 = vpop.permute.xlu0 %40  ;;  %v51_v55 = vpop.permute.xlu1 %50 }
  0x86   :  { %v66_v24 = vpop.permute.xlu0 %65 }
  0x87   :  { %v138_v28 = vpop.f32.mrf.mxu0  ;;  %v167_v29 = vpop.f32.mrf.mxu1 }
  0x88   :  { %v139_v30 = vadd.f32 %v138_v28, %v36_v27  ;;  %v168_v31 = vadd.f32 %v167_v29, %v36_v27 }
  0x8a   :  { %v245_v32 = vpack.c.bf16 %v168_v31, %v139_v30 }
  0x8c   :  { %261 = vst [vmem:[%s451_s3] sm:$0xff] %v245_v32 }
  0x8e   :  { %v196_v34 = vpop.f32.mrf.mxu2  ;;  %v225_v35 = vpop.f32.mrf.mxu3 }
  0x8f   :  { %v197_v36 = vadd.f32 %v196_v34, %v36_v27  ;;  %v226_v37 = vadd.f32 %v225_v35, %v36_v27  ;;  %v140_v38 = vpop.f32.mrf.mxu0  ;;  %v169_v39 = vpop.f32.mrf.mxu1 }
  0x90   :  { %v141_v40 = vadd.f32 %v140_v38, %v41_v33  ;;  %v170_v41 = vadd.f32 %v169_v39, %v41_v33  ;;  %v71_v35 = vpop.permute.xlu1 %70 }
  0x91   :  { %v246_v42 = vpack.c.bf16 %v226_v37, %v197_v36 }
  0x92   :  { %v247_v43 = vpack.c.bf16 %v170_v41, %v141_v40 }
  0x93   :  { %262 = vst [vmem:[%s451_s3 + $0x8] sm:$0xff] %v246_v42 }
  0x94   :  { %263 = vst [vmem:[%s451_s3 + $0x10] sm:$0xff] %v247_v43 }
  0x96   :  { %v198_v45 = vpop.f32.mrf.mxu2  ;;  %v227_v46 = vpop.f32.mrf.mxu3 }
  0x97   :  { %v199_v47 = vadd.f32 %v198_v45, %v41_v33  ;;  %v228_v48 = vadd.f32 %v227_v46, %v41_v33  ;;  %v143_v49 = vpop.f32.mrf.mxu0  ;;  %v172_v50 = vpop.f32.mrf.mxu1 }
  0x98   :  { %v144_v51 = vadd.f32 %v143_v49, %v46_v44  ;;  %v173_v52 = vadd.f32 %v172_v50, %v46_v44 }
  0x99   :  { %v248_v53 = vpack.c.bf16 %v228_v48, %v199_v47 }
  0x9a   :  { %v249_v54 = vpack.c.bf16 %v173_v52, %v144_v51 }
  0x9b   :  { %264 = vst [vmem:[%s451_s3 + $0x18] sm:$0xff] %v248_v53 }
  0x9c   :  { %265 = vst [vmem:[%s451_s3 + $0x20] sm:$0xff] %v249_v54 }
  0x9e   :  { %v201_v56 = vpop.f32.mrf.mxu2  ;;  %v230_v57 = vpop.f32.mrf.mxu3 }
  0x9f   :  { %v202_v58 = vadd.f32 %v201_v56, %v46_v44  ;;  %v231_v59 = vadd.f32 %v230_v57, %v46_v44  ;;  %v145_v60 = vpop.f32.mrf.mxu0  ;;  %v174_v61 = vpop.f32.mrf.mxu1 }
  0xa0   :  { %v146_v62 = vadd.f32 %v145_v60, %v51_v55  ;;  %v175_v63 = vadd.f32 %v174_v61, %v51_v55 }
  0xa1   :  { %v250_v0 = vpack.c.bf16 %v231_v59, %v202_v58 }
  0xa2   :  { %v251_v1 = vpack.c.bf16 %v175_v63, %v146_v62 }
  0xa3   :  { %266 = vst [vmem:[%s451_s3 + $0x28] sm:$0xff] %v250_v0 }
  0xa4   :  { %267 = vst [vmem:[%s451_s3 + $0x30] sm:$0xff] %v251_v1 }
  0xa6   :  { %v203_v3 = vpop.f32.mrf.mxu2  ;;  %v232_v4 = vpop.f32.mrf.mxu3 }
  0xa7   :  { %v204_v5 = vadd.f32 %v203_v3, %v51_v55  ;;  %v233_v6 = vadd.f32 %v232_v4, %v51_v55  ;;  %v148_v7 = vpop.f32.mrf.mxu0  ;;  %v177_v8 = vpop.f32.mrf.mxu1 }
  0xa8   :  { %v149_v9 = vadd.f32 %v148_v7, %v56_v2  ;;  %v178_v10 = vadd.f32 %v177_v8, %v56_v2 }
  0xa9   :  { %v252_v11 = vpack.c.bf16 %v233_v6, %v204_v5 }
  0xaa   :  { %v253_v12 = vpack.c.bf16 %v178_v10, %v149_v9 }
  0xab   :  { %268 = vst [vmem:[%s451_s3 + $0x38] sm:$0xff] %v252_v11 }
  0xac   :  { %269 = vst [vmem:[%s451_s3 + $0x40] sm:$0xff] %v253_v12 }
  0xae   :  { %v206_v14 = vpop.f32.mrf.mxu2  ;;  %v235_v15 = vpop.f32.mrf.mxu3 }
  0xaf   :  { %v207_v16 = vadd.f32 %v206_v14, %v56_v2  ;;  %v236_v17 = vadd.f32 %v235_v15, %v56_v2  ;;  %v150_v18 = vpop.f32.mrf.mxu0  ;;  %v179_v19 = vpop.f32.mrf.mxu1 }
  0xb0   :  { %v151_v20 = vadd.f32 %v150_v18, %v61_v13  ;;  %v180_v21 = vadd.f32 %v179_v19, %v61_v13 }
  0xb1   :  { %v254_v22 = vpack.c.bf16 %v236_v17, %v207_v16 }
  0xb2   :  { %v255_v23 = vpack.c.bf16 %v180_v21, %v151_v20 }
  0xb3   :  { %270 = vst [vmem:[%s451_s3 + $0x48] sm:$0xff] %v254_v22 }
  0xb4   :  { %271 = vst [vmem:[%s451_s3 + $0x50] sm:$0xff] %v255_v23 }
  0xb6   :  { %v208_v25 = vpop.f32.mrf.mxu2  ;;  %v237_v26 = vpop.f32.mrf.mxu3 }
  0xb7   :  { %v209_v27 = vadd.f32 %v208_v25, %v61_v13  ;;  %v238_v28 = vadd.f32 %v237_v26, %v61_v13  ;;  %v153_v29 = vpop.f32.mrf.mxu0  ;;  %v182_v30 = vpop.f32.mrf.mxu1 }
  0xb8   :  { %v154_v31 = vadd.f32 %v153_v29, %v66_v24  ;;  %v183_v32 = vadd.f32 %v182_v30, %v66_v24 }
  0xb9   :  { %v256_v33 = vpack.c.bf16 %v238_v28, %v209_v27 }
  0xba   :  { %v257_v34 = vpack.c.bf16 %v183_v32, %v154_v31 }
  0xbb   :  { %272 = vst [vmem:[%s451_s3 + $0x58] sm:$0xff] %v256_v33 }
  0xbc   :  { %273 = vst [vmem:[%s451_s3 + $0x60] sm:$0xff] %v257_v34 }
  0xbe   :  { %v211_v36 = vpop.f32.mrf.mxu2  ;;  %v240_v37 = vpop.f32.mrf.mxu3 }
  0xbf   :  { %v212_v38 = vadd.f32 %v211_v36, %v66_v24  ;;  %v241_v39 = vadd.f32 %v240_v37, %v66_v24  ;;  %v155_v40 = vpop.f32.mrf.mxu0  ;;  %v184_v41 = vpop.f32.mrf.mxu1 }
  0xc0   :  { %v156_v42 = vadd.f32 %v155_v40, %v71_v35  ;;  %v185_v43 = vadd.f32 %v184_v41, %v71_v35 }
  0xc1   :  { %v258_v44 = vpack.c.bf16 %v241_v39, %v212_v38 }
  0xc2   :  { %v259_v45 = vpack.c.bf16 %v185_v43, %v156_v42 }
  0xc3   :  { %274 = vst [vmem:[%s451_s3 + $0x68] sm:$0xff] %v258_v44 }
  0xc4   :  { %275 = vst [vmem:[%s451_s3 + $0x70] sm:$0xff] %v259_v45 }
  0xc6   :  { %v213_v46 = vpop.f32.mrf.mxu2  ;;  %v242_v47 = vpop.f32.mrf.mxu3 }
  0xc7   :  { %v214_v48 = vadd.f32 %v213_v46, %v71_v35  ;;  %v243_v49 = vadd.f32 %v242_v47, %v71_v35 }
  0xc9   :  { %v260_v50 = vpack.c.bf16 %v243_v49, %v214_v48 }
  0xcb   :  { %276 = vst [vmem:[%s451_s3 + $0x78] sm:$0xff] %v260_v50 }

// kernel: decoder_unet_forward.17
= control target key start
LH: loop header
LB: loop body
LE: loop exit
PB: predicated region body
PF: predicated region fallthrough
CT: control target
= control target key end

     0   :  { %s951_s12 = smov 0   ;;  %s953_s13 = smov 0   ;;  %s1187_s0 = inlined_call_operand.vmem [shape: bf16[8,72], index: 0, kind: input, shape index: {}]   ;;  %s1188_s1 = inlined_call_operand.vmem [shape: bf16[72,8192], index: 1, kind: input, shape index: {}]   ;;  %s1189_s2 = inlined_call_operand.vmem [shape: f32[8,1], index: 2, kind: input, shape index: {}]   ;;  %s1190_s3 = inlined_call_operand.vmem [shape: bf16[8,8192], index: 3, kind: output, shape index: {}]  }
   0x1   :  { %s955_s14 = smov 0  }
   0x2 LB: > { %s698_s15 = sadd.s32 4294967295, %s928_s14   ;;  %s968_s16 = sadd.s32 1, %s928_s14   ;;  %s928_s14 = sphi %s955_s14, %s1193_s14   ;;  %s924_s13 = sphi %s953_s13, %s1192_s13   ;;  %s920_s12 = sphi %s951_s12, %s1191_s12  }
   0x3   : > { %s38_s17 = ssub.s32 %s928_s14, %s968_s16  ;;  %s41_s18 = sadd.s32 1, %s924_s13 }
   0x4   : > { %p39_p0 = scmp.eq.s32.totalorder %s38_s17, 0  ;;  %p48_p1 = scmp.ne.s32.totalorder %s924_s13, %s920_s12 }
   0x5   : > { %p49_p2 = scmp.eq.s32.totalorder %s928_s14, 0  ;;  %p701_p4 = scmp.ge.s32.totalorder %s928_s14, 8 }
   0x6   : > { %s977_s19 = scalar_select %p39_p0, %s924_s13, %s41_s18  }
   0x7   : > { %p50_p3 = por %p49_p2, %p48_p1  ;;  %127 = sbr.rel (%p701_p4) target bundleno = 52 (0x34), region = 24 }
   0xc   : > { %130 = sbr.rel (!%p50_p3) target bundleno = 52 (0x34), region = 28  ;;  %s132_s20 = sand.u32 (%p50_p3), 1, %s924_s13  }
   0xd   : > { %s845_s21 = sshll.u32 (%p50_p3), %s928_s14, 5  ;;  %s878_s22 = smul.u32 (%p50_p3), 288, %s132_s20 }
   0xe   : > { %s985_s25 = scalar_lea.vmem (%p50_p3), %s1188_s1, %s845_s21 }
   0xf   : > { %v150_v0 = vld [vmem:[%s985_s25] sm:$0xff] (%p50_p3)  ;;  %v152_v1 = vld [vmem:[%s985_s25 + $0x8] sm:$0xff] (%p50_p3)  ;;  %v154_v2 = vld [vmem:[%s985_s25 + $0x10] sm:$0xff] (%p50_p3)  ;;  %s990_s26 = scalar_lea.vmem (%p50_p3), [#allocation2], %s878_s22 }
  0x10   : > { %151 = vst [vmem:[%s990_s26] sm:$0xff] (%p50_p3), %v150_v0  ;;  %v156_v3 = vld [vmem:[%s985_s25 + $0x18] sm:$0xff] (%p50_p3)  ;;  %v158_v4 = vld [vmem:[%s985_s25 + $0x100] sm:$0xff] (%p50_p3)  ;;  %v160_v5 = vld [vmem:[%s985_s25 + $0x108] sm:$0xff] (%p50_p3) }
  0x11   : > { %153 = vst [vmem:[%s990_s26 + $0x8] sm:$0xff] %v152_v1  ;;  %v162_v6 = vld [vmem:[%s985_s25 + $0x110] sm:$0xff]  ;;  %v164_v7 = vld [vmem:[%s985_s25 + $0x118] sm:$0xff]  ;;  %v166_v8 = vld [vmem:[%s985_s25 + $0x200] sm:$0xff] }
  0x12   : > { %155 = vst [vmem:[%s990_s26 + $0x10] sm:$0xff] %v154_v2  ;;  %v168_v9 = vld [vmem:[%s985_s25 + $0x208] sm:$0xff]  ;;  %v170_v10 = vld [vmem:[%s985_s25 + $0x210] sm:$0xff]  ;;  %v172_v11 = vld [vmem:[%s985_s25 + $0x218] sm:$0xff] }
  0x13   : > { %157 = vst [vmem:[%s990_s26 + $0x18] sm:$0xff] %v156_v3  ;;  %v174_v12 = vld [vmem:[%s985_s25 + $0x300] sm:$0xff]  ;;  %v176_v13 = vld [vmem:[%s985_s25 + $0x308] sm:$0xff]  ;;  %v178_v14 = vld [vmem:[%s985_s25 + $0x310] sm:$0xff] }
  0x14   : > { %159 = vst [vmem:[%s990_s26 + $0x20] sm:$0xff] %v158_v4  ;;  %v180_v15 = vld [vmem:[%s985_s25 + $0x318] sm:$0xff]  ;;  %v182_v16 = vld [vmem:[%s985_s25 + $0x400] sm:$0xff]  ;;  %v184_v17 = vld [vmem:[%s985_s25 + $0x408] sm:$0xff] }
  0x15   : > { %161 = vst [vmem:[%s990_s26 + $0x28] sm:$0xff] %v160_v5  ;;  %v186_v18 = vld [vmem:[%s985_s25 + $0x410] sm:$0xff]  ;;  %v188_v19 = vld [vmem:[%s985_s25 + $0x418] sm:$0xff]  ;;  %v190_v20 = vld [vmem:[%s985_s25 + $0x500] sm:$0xff] }
  0x16   : > { %163 = vst [vmem:[%s990_s26 + $0x30] sm:$0xff] %v162_v6  ;;  %v192_v21 = vld [vmem:[%s985_s25 + $0x508] sm:$0xff]  ;;  %v194_v22 = vld [vmem:[%s985_s25 + $0x510] sm:$0xff]  ;;  %v196_v23 = vld [vmem:[%s985_s25 + $0x518] sm:$0xff] }
  0x17   : > { %165 = vst [vmem:[%s990_s26 + $0x38] sm:$0xff] %v164_v7  ;;  %v198_v24 = vld [vmem:[%s985_s25 + $0x600] sm:$0xff]  ;;  %v200_v25 = vld [vmem:[%s985_s25 + $0x608] sm:$0xff]  ;;  %v202_v26 = vld [vmem:[%s985_s25 + $0x610] sm:$0xff] }
  0x18   : > { %167 = vst [vmem:[%s990_s26 + $0x40] sm:$0xff] %v166_v8  ;;  %v204_v27 = vld [vmem:[%s985_s25 + $0x618] sm:$0xff]  ;;  %v206_v28 = vld [vmem:[%s985_s25 + $0x700] sm:$0xff]  ;;  %v208_v29 = vld [vmem:[%s985_s25 + $0x708] sm:$0xff] }
  0x19   : > { %169 = vst [vmem:[%s990_s26 + $0x48] sm:$0xff] %v168_v9  ;;  %v210_v30 = vld [vmem:[%s985_s25 + $0x710] sm:$0xff]  ;;  %v212_v31 = vld [vmem:[%s985_s25 + $0x718] sm:$0xff]  ;;  %v214_v32 = vld [vmem:[%s985_s25 + $0x800] sm:$0xff] }
  0x1a   : > { %171 = vst [vmem:[%s990_s26 + $0x50] sm:$0xff] %v170_v10  ;;  %v216_v33 = vld [vmem:[%s985_s25 + $0x808] sm:$0xff]  ;;  %v218_v34 = vld [vmem:[%s985_s25 + $0x810] sm:$0xff]  ;;  %v220_v35 = vld [vmem:[%s985_s25 + $0x818] sm:$0xff] }
  0x1b   : > { %173 = vst [vmem:[%s990_s26 + $0x58] sm:$0xff] %v172_v11 }
  0x1c   : > { %175 = vst [vmem:[%s990_s26 + $0x60] sm:$0xff] %v174_v12 }
  0x1d   : > { %177 = vst [vmem:[%s990_s26 + $0x68] sm:$0xff] %v176_v13 }
  0x1e   : > { %179 = vst [vmem:[%s990_s26 + $0x70] sm:$0xff] %v178_v14 }
  0x1f   : > { %181 = vst [vmem:[%s990_s26 + $0x78] sm:$0xff] %v180_v15 }
  0x20   : > { %183 = vst [vmem:[%s990_s26 + $0x80] sm:$0xff] %v182_v16 }
  0x21   : > { %185 = vst [vmem:[%s990_s26 + $0x88] sm:$0xff] %v184_v17 }
  0x22   : > { %187 = vst [vmem:[%s990_s26 + $0x90] sm:$0xff] %v186_v18 }
  0x23   : > { %189 = vst [vmem:[%s990_s26 + $0x98] sm:$0xff] %v188_v19 }
  0x24   : > { %191 = vst [vmem:[%s990_s26 + $0xa0] sm:$0xff] %v190_v20 }
  0x25   : > { %193 = vst [vmem:[%s990_s26 + $0xa8] sm:$0xff] %v192_v21 }
  0x26   : > { %195 = vst [vmem:[%s990_s26 + $0xb0] sm:$0xff] %v194_v22 }
  0x27   : > { %197 = vst [vmem:[%s990_s26 + $0xb8] sm:$0xff] %v196_v23 }
  0x28   : > { %199 = vst [vmem:[%s990_s26 + $0xc0] sm:$0xff] %v198_v24 }
  0x29   : > { %201 = vst [vmem:[%s990_s26 + $0xc8] sm:$0xff] %v200_v25 }
  0x2a   : > { %203 = vst [vmem:[%s990_s26 + $0xd0] sm:$0xff] %v202_v26 }
  0x2b   : > { %205 = vst [vmem:[%s990_s26 + $0xd8] sm:$0xff] %v204_v27 }
  0x2c   : > { %207 = vst [vmem:[%s990_s26 + $0xe0] sm:$0xff] %v206_v28 }
  0x2d   : > { %209 = vst [vmem:[%s990_s26 + $0xe8] sm:$0xff] %v208_v29 }
  0x2e   : > { %211 = vst [vmem:[%s990_s26 + $0xf0] sm:$0xff] %v210_v30 }
  0x2f   : > { %213 = vst [vmem:[%s990_s26 + $0xf8] sm:$0xff] %v212_v31 }
  0x30   : > { %215 = vst [vmem:[%s990_s26 + $0x100] sm:$0xff] %v214_v32 }
  0x31   : > { %217 = vst [vmem:[%s990_s26 + $0x108] sm:$0xff] %v216_v33 }
  0x32   : > { %219 = vst [vmem:[%s990_s26 + $0x110] sm:$0xff] %v218_v34 }
  0x33   : > { %221 = vst [vmem:[%s990_s26 + $0x118] sm:$0xff] %v220_v35 }
  0x34 PF: > { %p704_p5 = scmp.ge.s32.totalorder %s928_s14, 1  ;;  %p226_p6 = scmp.lt.s32.totalorder %s928_s14, 9 }
  0x36   : > { %p227_p7 = pnand %p704_p5, %p226_p6 }
  0x37   : > { %s233_s27 = sand.u32 (!%p227_p7), 1, %s920_s12   ;;  %s705_s7 = sshll.u32 (!%p227_p7), %s698_s15, 3 }
  0x38   : > { %230 = sbr.rel (%p227_p7) target bundleno = 247 (0xf7), region = 51  ;;  %p258_p8 = scmp.lt.s32.totalorder (!%p227_p7), %s705_s7, 63 }
  0x39   : > { %s879_s28 = smul.u32 (!%p227_p7), 288, %s233_s27 }
  0x3b   : > { %s1064_s29 = scalar_lea.vmem (!%p227_p7), [#allocation2], %s879_s28 }
  0x3d   : > { %v297_v36 = vld [vmem:[%s1064_s29 + $0x100] sm:$0xff]  ;;  %v298_v37 = vld [vmem:[%s1064_s29 + $0x108] sm:$0xff]  ;;  %vm491_vm0 = vcmask 1043456   ;;  %v299_v18 = vld [vmem:[%s1064_s29 + $0x110] sm:$0xff]  ;;  %v930_v22 = vmov 0   ;;  %vm487_vm1 = vcmask 588800  }
  0x3e   : > { %v407_v38 = vunpack.c.l.b16 %v297_v36  ;;  %v408_v39 = vunpack.c.h.b16 %v297_v36  ;;  %v409_v40 = vunpack.c.l.b16 %v298_v37  ;;  %v410_v41 = vunpack.c.h.b16 %v298_v37  ;;  %v805_v42 = vld [vmem:[%s1064_s29 + $0xc0] sm:$0xf]  ;;  %v870_v48 = vld [vmem:[%s1064_s29 + $0xc4] sm:$0xf]  ;;  %v813_v50 = vld [vmem:[%s1064_s29 + $0xc8] sm:$0xf]  ;;  %905 = vset.pattern.permute.xlu0 %v930_v22 }
  0x3f   : > { %v874_v43 = vld [vmem:[%s1064_s29 + $0xdc] sm:$0xf0]  ;;  %v807_v49 = vld [vmem:[%s1064_s29 + $0xe0] sm:$0xf0]  ;;  %v875_v51 = vld [vmem:[%s1064_s29 + $0xe4] sm:$0xf0]  ;;  %v411_v20 = vunpack.c.l.b16 %v299_v18  ;;  %v412_v21 = vunpack.c.h.b16 %v299_v18 }
  0x40   : > { %v447_v44 = vpack.c.b16 %v407_v38, %v407_v38  ;;  %v448_v45 = vpack.c.b16 %v408_v39, %v408_v39  ;;  %v449_v46 = vpack.c.b16 %v409_v40, %v409_v40  ;;  %v450_v47 = vpack.c.b16 %v410_v41, %v410_v41  ;;  %v871_v52 = vld [vmem:[%s1064_s29 + $0xcc] sm:$0xf]  ;;  %v773_v60 = vld [vmem:[%s1064_s29 + $0x80] sm:$0xf]  ;;  %v862_v0 = vld [vmem:[%s1064_s29 + $0x84] sm:$0xf] }
  0x41   : > { %v815_v53 = vld [vmem:[%s1064_s29 + $0xe8] sm:$0xf0]  ;;  %v806_v58 = vor.u32 %v874_v43, %v805_v42  ;;  %v810_v59 = vor.u32 %v870_v48, %v807_v49  ;;  %v866_v61 = vld [vmem:[%s1064_s29 + $0x9c] sm:$0xf0]  ;;  %v814_v62 = vor.u32 %v875_v51, %v813_v50  ;;  %v775_v1 = vld [vmem:[%s1064_s29 + $0xa0] sm:$0xf0]  ;;  %v451_v38 = vpack.c.b16 %v411_v20, %v411_v20 }
  0x42   : > { %v493_v54 = vsel %vm491_vm0, %v447_v44, 0  ;;  %v496_v55 = vsel %vm491_vm0, %v448_v45, 0  ;;  %v499_v56 = vsel %vm491_vm0, %v449_v46, 0  ;;  %v502_v57 = vsel %vm491_vm0, %v450_v47, 0  ;;  %v781_v2 = vld [vmem:[%s1064_s29 + $0x88] sm:$0xf] }
  0x43   : > { %519 = vmatpush.bf16.msra.mxu0 %v493_v54  ;;  %532 = vmatpush.bf16.msra.mxu1 %v496_v55  ;;  %v818_v63 = vor.u32 %v871_v52, %v815_v53  ;;  %v867_v3 = vld [vmem:[%s1064_s29 + $0xa4] sm:$0xf0]  ;;  %v863_v4 = vld [vmem:[%s1064_s29 + $0x8c] sm:$0xf]  ;;  %v741_v6 = vld [vmem:[%s1064_s29 + $0x40] sm:$0xf]  ;;  %v774_v7 = vor.u32 %v866_v61, %v773_v60  ;;  %v778_v8 = vor.u32 %v862_v0, %v775_v1 }
  0x44   : > { %545 = vmatpush.bf16.msra.mxu2 %v499_v56  ;;  %558 = vmatpush.bf16.msra.mxu3 %v502_v57  ;;  %v783_v5 = vld [vmem:[%s1064_s29 + $0xa8] sm:$0xf0]  ;;  %v858_v9 = vld [vmem:[%s1064_s29 + $0x5c] sm:$0xf0]  ;;  %v854_v10 = vld [vmem:[%s1064_s29 + $0x44] sm:$0xf]  ;;  %v782_v12 = vor.u32 %v867_v3, %v781_v2  ;;  %v452_v39 = vpack.c.b16 %v412_v21, %v412_v21 }
  0x45   : > { %v743_v11 = vld [vmem:[%s1064_s29 + $0x60] sm:$0xf0]  ;;  %v786_v13 = vor.u32 %v863_v4, %v783_v5  ;;  %v749_v14 = vld [vmem:[%s1064_s29 + $0x48] sm:$0xf]  ;;  %v855_v16 = vld [vmem:[%s1064_s29 + $0x4c] sm:$0xf]  ;;  %v742_v23 = vor.u32 %v858_v9, %v741_v6 }
  0x46   : > { %v859_v15 = vld [vmem:[%s1064_s29 + $0x64] sm:$0xf0]  ;;  %v751_v17 = vld [vmem:[%s1064_s29 + $0x68] sm:$0xf0]  ;;  %v300_v19 = vld [vmem:[%s1064_s29 + $0x118] sm:$0xff]  ;;  %v746_v24 = vor.u32 %v854_v10, %v743_v11  ;;  %v505_v50 = vsel %vm491_vm0, %v451_v38, 0 }
  0x47   : > { %520 = vmatpush.bf16.msra.mxu0 %v806_v58  ;;  %533 = vmatpush.bf16.msra.mxu1 %v810_v59  ;;  %v709_v25 = vld [vmem:[%s1064_s29] sm:$0xf]  ;;  %v413_v27 = vunpack.c.l.b16 %v300_v19  ;;  %v414_v28 = vunpack.c.h.b16 %v300_v19  ;;  %v750_v29 = vor.u32 %v859_v15, %v749_v14  ;;  %v754_v30 = vor.u32 %v855_v16, %v751_v17  ;;  %v846_v31 = vld [vmem:[%s1064_s29 + $0x4] sm:$0xf]  ;;  %v717_v33 = vld [vmem:[%s1064_s29 + $0x8] sm:$0xf] }
  0x48   : > { %546 = vmatpush.bf16.msra.mxu2 %v814_v62  ;;  %559 = vmatpush.bf16.msra.mxu3 %v818_v63  ;;  %v850_v26 = vld [vmem:[%s1064_s29 + $0x1c] sm:$0xf0]  ;;  %v711_v32 = vld [vmem:[%s1064_s29 + $0x20] sm:$0xf0]  ;;  %v851_v34 = vld [vmem:[%s1064_s29 + $0x24] sm:$0xf0] }
  0x49   : > { %v847_v35 = vld [vmem:[%s1064_s29 + $0xc] sm:$0xf]  ;;  %v710_v37 = vor.u32 %v850_v26, %v709_v25  ;;  %v301_v40 = vld [vmem:[%s1189_s2] sm:$0xff]  ;;  %v714_v41 = vor.u32 %v846_v31, %v711_v32  ;;  %v453_v42 = vpack.c.b16 %v413_v27, %v413_v27  ;;  %v454_v43 = vpack.c.b16 %v414_v28, %v414_v28  ;;  %v821_v46 = vld [vmem:[%s1064_s29 + $0xd0] sm:$0xf]  ;;  %s1195_s7 = smov (!%p258_p8, %s705_s7), 63 }
  0x4a   : > { %v719_v36 = vld [vmem:[%s1064_s29 + $0x28] sm:$0xf0]  ;;  %v718_v44 = vor.u32 %v851_v34, %v717_v33  ;;  %v876_v47 = vld [vmem:[%s1064_s29 + $0xec] sm:$0xf0]  ;;  %v872_v48 = vld [vmem:[%s1064_s29 + $0xd4] sm:$0xf]  ;;  %304 = vperm.xlu0 %905, %v301_v40  }
  0x4b   : > { %521 = vmatpush.bf16.msra.mxu0 %v774_v7  ;;  %534 = vmatpush.bf16.msra.mxu1 %v778_v8  ;;  %v722_v45 = vor.u32 %v847_v35, %v719_v36  ;;  %v823_v49 = vld [vmem:[%s1064_s29 + $0xf0] sm:$0xf0]  ;;  %v508_v51 = vsel %vm491_vm0, %v452_v39, 0  ;;  %v829_v52 = vld [vmem:[%s1064_s29 + $0xd8] sm:$0xf]  ;;  %v511_v54 = vsel %vm491_vm0, %v453_v42, 0  ;;  %v822_v59 = vor.u32 %v876_v47, %v821_v46 }
  0x4c   : > { %547 = vmatpush.bf16.msra.mxu2 %v782_v12  ;;  %560 = vmatpush.bf16.msra.mxu3 %v786_v13  ;;  %v877_v53 = vld [vmem:[%s1064_s29 + $0xf4] sm:$0xf0]  ;;  %v514_v55 = vsel %vm491_vm0, %v454_v43, 0  ;;  %v873_v56 = vld [vmem:[%s1064_s29 + $0xdc] sm:$0xf]  ;;  %v826_v60 = vor.u32 %v872_v48, %v823_v49  ;;  %s706_s8 = sshll.u32 %s1195_s7, 2 }
  0x4d   : > { %v831_v57 = vld [vmem:[%s1064_s29 + $0xf8] sm:$0xf0]  ;;  %v1124_v58 = vld [vmem:[%s1187_s0] sm:$0xf]  ;;  %v789_v61 = vld [vmem:[%s1064_s29 + $0x90] sm:$0xf]  ;;  %v830_v63 = vor.u32 %v877_v53, %v829_v52  ;;  %s1171_s11 = scalar_lea.vmem %s1190_s3, %s706_s8 }
  0x4e   : > { %v868_v62 = vld [vmem:[%s1064_s29 + $0xac] sm:$0xf0]  ;;  %v834_v0 = vor.u32 %v873_v56, %v831_v57  ;;  %v864_v1 = vld [vmem:[%s1064_s29 + $0x94] sm:$0xf]  ;;  %v797_v3 = vld [vmem:[%s1064_s29 + $0x98] sm:$0xf] }
  0x4f   : > { %522 = vmatpush.bf16.msra.mxu0 %v742_v23  ;;  %535 = vmatpush.bf16.msra.mxu1 %v746_v24  ;;  %v791_v2 = vld [vmem:[%s1064_s29 + $0xb0] sm:$0xf0]  ;;  %v869_v4 = vld [vmem:[%s1064_s29 + $0xb4] sm:$0xf0]  ;;  %v865_v5 = vld [vmem:[%s1064_s29 + $0x9c] sm:$0xf]  ;;  %v790_v7 = vor.u32 %v868_v62, %v789_v61 }
  0x50   : > { %548 = vmatpush.bf16.msra.mxu2 %v750_v29  ;;  %561 = vmatpush.bf16.msra.mxu3 %v754_v30  ;;  %v799_v6 = vld [vmem:[%s1064_s29 + $0xb8] sm:$0xf0]  ;;  %v794_v8 = vor.u32 %v864_v1, %v791_v2  ;;  %v757_v9 = vld [vmem:[%s1064_s29 + $0x50] sm:$0xf]  ;;  %v798_v11 = vor.u32 %v869_v4, %v797_v3  ;;  %v856_v13 = vld [vmem:[%s1064_s29 + $0x54] sm:$0xf] }
  0x51   : > { %v860_v10 = vld [vmem:[%s1064_s29 + $0x6c] sm:$0xf0]  ;;  %v802_v12 = vor.u32 %v865_v5, %v799_v6  ;;  %v759_v14 = vld [vmem:[%s1064_s29 + $0x70] sm:$0xf0]  ;;  %v765_v15 = vld [vmem:[%s1064_s29 + $0x58] sm:$0xf] }
  0x52   : > { %v861_v16 = vld [vmem:[%s1064_s29 + $0x74] sm:$0xf0]  ;;  %v857_v17 = vld [vmem:[%s1064_s29 + $0x5c] sm:$0xf]  ;;  %v758_v19 = vor.u32 %v860_v10, %v757_v9  ;;  %v762_v20 = vor.u32 %v856_v13, %v759_v14  ;;  %v725_v21 = vld [vmem:[%s1064_s29 + $0x10] sm:$0xf] }
  0x53   : > { %523 = vmatpush.bf16.msra.mxu0 %v710_v37  ;;  %536 = vmatpush.bf16.msra.mxu1 %v714_v41  ;;  %v767_v18 = vld [vmem:[%s1064_s29 + $0x78] sm:$0xf0]  ;;  %v852_v22 = vld [vmem:[%s1064_s29 + $0x2c] sm:$0xf0]  ;;  %v766_v23 = vor.u32 %v861_v16, %v765_v15  ;;  %v848_v25 = vld [vmem:[%s1064_s29 + $0x14] sm:$0xf] }
  0x54   : > { %549 = vmatpush.bf16.msra.mxu2 %v718_v44  ;;  %562 = vmatpush.bf16.msra.mxu3 %v722_v45  ;;  %v770_v24 = vor.u32 %v857_v17, %v767_v18  ;;  %v727_v26 = vld [vmem:[%s1064_s29 + $0x30] sm:$0xf0]  ;;  %v733_v27 = vld [vmem:[%s1064_s29 + $0x18] sm:$0xf]  ;;  %v849_v29 = vld [vmem:[%s1064_s29 + $0x1c] sm:$0xf]  ;;  %v726_v31 = vor.u32 %v852_v22, %v725_v21 }
  0x55   : > { %v853_v28 = vld [vmem:[%s1064_s29 + $0x34] sm:$0xf0]  ;;  %v735_v30 = vld [vmem:[%s1064_s29 + $0x38] sm:$0xf0]  ;;  %v730_v32 = vor.u32 %v848_v25, %v727_v26 }
  0x56   : > { %835 = vmatmul.msk.bf16.vlgmr.msra.gmra.mxu0 %vm487_vm1, %v1124_v58  ;;  %836 = vmatmul.msk.bf16.vlgmr.msra.gmra.mxu1 %vm487_vm1, %v1124_v58  ;;  %v734_v33 = vor.u32 %v853_v28, %v733_v27  ;;  %v738_v34 = vor.u32 %v849_v29, %v735_v30 }
  0x57   : > { %571 = vmatpush.bf16.msrb.mxu0 %v505_v50  ;;  %584 = vmatpush.bf16.msrb.mxu1 %v508_v51 }
  0x58   : > { %597 = vmatpush.bf16.msrb.mxu2 %v511_v54  ;;  %610 = vmatpush.bf16.msrb.mxu3 %v514_v55 }
  0x59   : > { %837 = vmatmul.msk.bf16.vlgmr.msra.gmra.mxu2 %vm487_vm1, %v1124_v58  ;;  %838 = vmatmul.msk.bf16.vlgmr.msra.gmra.mxu3 %vm487_vm1, %v1124_v58 }
  0x5b   : > { %572 = vmatpush.bf16.msrb.mxu0 %v822_v59  ;;  %585 = vmatpush.bf16.msrb.mxu1 %v826_v60 }
  0x5c   : > { %598 = vmatpush.bf16.msrb.mxu2 %v830_v63  ;;  %611 = vmatpush.bf16.msrb.mxu3 %v834_v0 }
  0x5f   : > { %573 = vmatpush.bf16.msrb.mxu0 %v790_v7  ;;  %586 = vmatpush.bf16.msrb.mxu1 %v794_v8 }
  0x60   : > { %599 = vmatpush.bf16.msrb.mxu2 %v798_v11  ;;  %612 = vmatpush.bf16.msrb.mxu3 %v802_v12 }
  0x63   : > { %574 = vmatpush.bf16.msrb.mxu0 %v758_v19  ;;  %587 = vmatpush.bf16.msrb.mxu1 %v762_v20 }
  0x64   : > { %600 = vmatpush.bf16.msrb.mxu2 %v766_v23  ;;  %613 = vmatpush.bf16.msrb.mxu3 %v770_v24 }
  0x67   : > { %575 = vmatpush.bf16.msrb.mxu0 %v726_v31  ;;  %588 = vmatpush.bf16.msrb.mxu1 %v730_v32 }
  0x68   : > { %601 = vmatpush.bf16.msrb.mxu2 %v734_v33  ;;  %614 = vmatpush.bf16.msrb.mxu3 %v738_v34 }
  0x6a   : > { %839 = vmatmul.msk.bf16.vlgmr.msrb.gmra.mxu0 %vm487_vm1, %v1124_v58  ;;  %840 = vmatmul.msk.bf16.vlgmr.msrb.gmra.mxu1 %vm487_vm1, %v1124_v58 }
  0x6b   : > { %841 = vmatmul.msk.bf16.vlgmr.msrb.gmra.mxu2 %vm487_vm1, %v1124_v58  ;;  %842 = vmatmul.msk.bf16.vlgmr.msrb.gmra.mxu3 %vm487_vm1, %v1124_v58 }
  0xbc   : > { %v305_v35 = vpop.permute.xlu0 %304 }
  0xd3   : > { %v525_v36 = vpop.f32.mrf.mxu0  ;;  %v538_v37 = vpop.f32.mrf.mxu1 }
  0xd4   : > { %v526_v38 = vadd.f32 %v525_v36, %v305_v35  ;;  %v539_v39 = vadd.f32 %v538_v37, %v305_v35 }
  0xd6   : > { %v620_v40 = vmax.f32 %v526_v38, 0.0  ;;  %v621_v41 = vmax.f32 %v539_v39, 0.0 }
  0xd8   : > { %v628_v42 = vpack.c.bf16 %v621_v41, %v620_v40 }
  0xda   : > { %632 = vst [vmem:[%s1171_s11] sm:$0xff] %v628_v42 }
  0xdb   : > { %v527_v47 = vpop.f32.mrf.mxu0  ;;  %v540_v48 = vpop.f32.mrf.mxu1 }
  0xdc   : > { %v551_v43 = vpop.f32.mrf.mxu2  ;;  %v564_v44 = vpop.f32.mrf.mxu3 }
  0xdd   : > { %v552_v45 = vadd.f32 %v551_v43, %v305_v35  ;;  %v565_v46 = vadd.f32 %v564_v44, %v305_v35 }
  0xdf   : > { %v622_v49 = vmax.f32 %v552_v45, 0.0  ;;  %v623_v50 = vmax.f32 %v565_v46, 0.0 }
  0xe1   : > { %v629_v51 = vpack.c.bf16 %v623_v50, %v622_v49 }
  0xe3   : > { %633 = vst [vmem:[%s1171_s11 + $0x8] sm:$0xff] %v629_v51 }
  0xe4   : > { %v553_v52 = vpop.f32.mrf.mxu2  ;;  %v566_v53 = vpop.f32.mrf.mxu3 }
  0xe7   : > { %v577_v54 = vpop.f32.mrf.mxu0  ;;  %v590_v55 = vpop.f32.mrf.mxu1 }
  0xe8   : > { %v578_v56 = vadd.f32 %v577_v54, %v305_v35  ;;  %v591_v57 = vadd.f32 %v590_v55, %v305_v35 }
  0xea   : > { %v624_v58 = vmax.f32 %v578_v56, 0.0  ;;  %v625_v59 = vmax.f32 %v591_v57, 0.0 }
  0xec   : > { %v630_v60 = vpack.c.bf16 %v625_v59, %v624_v58 }
  0xee   : > { %634 = vst [vmem:[%s1171_s11 + $0x10] sm:$0xff] %v630_v60  ;;  %v603_v61 = vpop.f32.mrf.mxu2  ;;  %v616_v62 = vpop.f32.mrf.mxu3 }
  0xef   : > { %v604_v63 = vadd.f32 %v603_v61, %v305_v35  ;;  %v617_v0 = vadd.f32 %v616_v62, %v305_v35  ;;  %v579_v1 = vpop.f32.mrf.mxu0  ;;  %v592_v2 = vpop.f32.mrf.mxu1 }
  0xf1   : > { %v626_v3 = vmax.f32 %v604_v63, 0.0  ;;  %v627_v4 = vmax.f32 %v617_v0, 0.0 }
  0xf3   : > { %v631_v5 = vpack.c.bf16 %v627_v4, %v626_v3 }
  0xf5   : > { %635 = vst [vmem:[%s1171_s11 + $0x18] sm:$0xff] %v631_v5 }
  0xf6   : > { %v605_v6 = vpop.f32.mrf.mxu2  ;;  %v618_v7 = vpop.f32.mrf.mxu3 }
  0xf7 PF: > { %p10_p9 = scmp.ge.s32.totalorder %s968_s16, 10   ;;  %s1191_s12 = smov %s924_s13 }
  0xf8   : > { %s1192_s13 = smov %s977_s19  ;;  %s1193_s14 = smov %s968_s16 }
  0xf9   :  { %12 = sbr.rel (!%p10_p9) target bundleno = 2 (0x2), region = 90 }

// kernel: decoder_unet_forward.18
= control target key start
LH: loop header
LB: loop body
LE: loop exit
PB: predicated region body
PF: predicated region fallthrough
CT: control target
= control target key end

     0   :  { %s743_s12 = smov 0   ;;  %s745_s13 = smov 0   ;;  %s905_s0 = inlined_call_operand.vmem [shape: bf16[8,40], index: 0, kind: input, shape index: {}]   ;;  %s906_s1 = inlined_call_operand.vmem [shape: bf16[40,8192], index: 1, kind: input, shape index: {}]   ;;  %s907_s2 = inlined_call_operand.vmem [shape: f32[8,1], index: 2, kind: input, shape index: {}]   ;;  %s908_s3 = inlined_call_operand.vmem [shape: bf16[8,8192], index: 3, kind: output, shape index: {}]  }
   0x1   :  { %s747_s14 = smov 0  }
   0x2 LB: > { %s570_s15 = sadd.s32 4294967295, %s720_s14   ;;  %s760_s16 = sadd.s32 1, %s720_s14   ;;  %s720_s14 = sphi %s747_s14, %s911_s14   ;;  %s716_s13 = sphi %s745_s13, %s910_s13   ;;  %s712_s12 = sphi %s743_s12, %s909_s12  }
   0x3   : > { %s38_s17 = ssub.s32 %s720_s14, %s760_s16  ;;  %s41_s18 = sadd.s32 1, %s716_s13 }
   0x4   : > { %p39_p0 = scmp.eq.s32.totalorder %s38_s17, 0  ;;  %p48_p1 = scmp.ne.s32.totalorder %s716_s13, %s712_s12 }
   0x5   : > { %p49_p2 = scmp.eq.s32.totalorder %s720_s14, 0  ;;  %p573_p4 = scmp.ge.s32.totalorder %s720_s14, 8 }
   0x6   : > { %s769_s19 = scalar_select %p39_p0, %s716_s13, %s41_s18  }
   0x7   : > { %p50_p3 = por %p49_p2, %p48_p1  ;;  %127 = sbr.rel (%p573_p4) target bundleno = 36 (0x24), region = 24 }
   0xc   : > { %130 = sbr.rel (!%p50_p3) target bundleno = 36 (0x24), region = 28  ;;  %s132_s20 = sand.u32 (%p50_p3), 1, %s716_s13  }
   0xd   : > { %s653_s21 = sshll.u32 (%p50_p3), %s720_s14, 5  ;;  %s670_s22 = smul.u32 (%p50_p3), 160, %s132_s20 }
   0xe   : > { %s777_s25 = scalar_lea.vmem (%p50_p3), %s906_s1, %s653_s21 }
   0xf   : > { %v150_v0 = vld [vmem:[%s777_s25] sm:$0xff] (%p50_p3)  ;;  %v152_v1 = vld [vmem:[%s777_s25 + $0x8] sm:$0xff] (%p50_p3)  ;;  %v154_v2 = vld [vmem:[%s777_s25 + $0x10] sm:$0xff] (%p50_p3)  ;;  %s782_s26 = scalar_lea.vmem (%p50_p3), [#allocation2], %s670_s22 }
  0x10   : > { %151 = vst [vmem:[%s782_s26] sm:$0xff] (%p50_p3), %v150_v0  ;;  %v156_v3 = vld [vmem:[%s777_s25 + $0x18] sm:$0xff] (%p50_p3)  ;;  %v158_v4 = vld [vmem:[%s777_s25 + $0x100] sm:$0xff] (%p50_p3)  ;;  %v160_v5 = vld [vmem:[%s777_s25 + $0x108] sm:$0xff] (%p50_p3) }
  0x11   : > { %153 = vst [vmem:[%s782_s26 + $0x8] sm:$0xff] %v152_v1  ;;  %v162_v6 = vld [vmem:[%s777_s25 + $0x110] sm:$0xff]  ;;  %v164_v7 = vld [vmem:[%s777_s25 + $0x118] sm:$0xff]  ;;  %v166_v8 = vld [vmem:[%s777_s25 + $0x200] sm:$0xff] }
  0x12   : > { %155 = vst [vmem:[%s782_s26 + $0x10] sm:$0xff] %v154_v2  ;;  %v168_v9 = vld [vmem:[%s777_s25 + $0x208] sm:$0xff]  ;;  %v170_v10 = vld [vmem:[%s777_s25 + $0x210] sm:$0xff]  ;;  %v172_v11 = vld [vmem:[%s777_s25 + $0x218] sm:$0xff] }
  0x13   : > { %157 = vst [vmem:[%s782_s26 + $0x18] sm:$0xff] %v156_v3  ;;  %v174_v12 = vld [vmem:[%s777_s25 + $0x300] sm:$0xff]  ;;  %v176_v13 = vld [vmem:[%s777_s25 + $0x308] sm:$0xff]  ;;  %v178_v14 = vld [vmem:[%s777_s25 + $0x310] sm:$0xff] }
  0x14   : > { %159 = vst [vmem:[%s782_s26 + $0x20] sm:$0xff] %v158_v4  ;;  %v180_v15 = vld [vmem:[%s777_s25 + $0x318] sm:$0xff]  ;;  %v182_v16 = vld [vmem:[%s777_s25 + $0x400] sm:$0xff]  ;;  %v184_v17 = vld [vmem:[%s777_s25 + $0x408] sm:$0xff] }
  0x15   : > { %161 = vst [vmem:[%s782_s26 + $0x28] sm:$0xff] %v160_v5  ;;  %v186_v18 = vld [vmem:[%s777_s25 + $0x410] sm:$0xff]  ;;  %v188_v19 = vld [vmem:[%s777_s25 + $0x418] sm:$0xff] }
  0x16   : > { %163 = vst [vmem:[%s782_s26 + $0x30] sm:$0xff] %v162_v6 }
  0x17   : > { %165 = vst [vmem:[%s782_s26 + $0x38] sm:$0xff] %v164_v7 }
  0x18   : > { %167 = vst [vmem:[%s782_s26 + $0x40] sm:$0xff] %v166_v8 }
  0x19   : > { %169 = vst [vmem:[%s782_s26 + $0x48] sm:$0xff] %v168_v9 }
  0x1a   : > { %171 = vst [vmem:[%s782_s26 + $0x50] sm:$0xff] %v170_v10 }
  0x1b   : > { %173 = vst [vmem:[%s782_s26 + $0x58] sm:$0xff] %v172_v11 }
  0x1c   : > { %175 = vst [vmem:[%s782_s26 + $0x60] sm:$0xff] %v174_v12 }
  0x1d   : > { %177 = vst [vmem:[%s782_s26 + $0x68] sm:$0xff] %v176_v13 }
  0x1e   : > { %179 = vst [vmem:[%s782_s26 + $0x70] sm:$0xff] %v178_v14 }
  0x1f   : > { %181 = vst [vmem:[%s782_s26 + $0x78] sm:$0xff] %v180_v15 }
  0x20   : > { %183 = vst [vmem:[%s782_s26 + $0x80] sm:$0xff] %v182_v16 }
  0x21   : > { %185 = vst [vmem:[%s782_s26 + $0x88] sm:$0xff] %v184_v17 }
  0x22   : > { %187 = vst [vmem:[%s782_s26 + $0x90] sm:$0xff] %v186_v18 }
  0x23   : > { %189 = vst [vmem:[%s782_s26 + $0x98] sm:$0xff] %v188_v19 }
  0x24 PF: > { %p576_p5 = scmp.ge.s32.totalorder %s720_s14, 1  ;;  %p194_p6 = scmp.lt.s32.totalorder %s720_s14, 9 }
  0x26   : > { %p195_p7 = pnand %p576_p5, %p194_p6 }
  0x27   : > { %s201_s27 = sand.u32 (!%p195_p7), 1, %s712_s12   ;;  %s577_s7 = sshll.u32 (!%p195_p7), %s570_s15, 3 }
  0x28   : > { %198 = sbr.rel (%p195_p7) target bundleno = 219 (0xdb), region = 51  ;;  %p226_p8 = scmp.lt.s32.totalorder (!%p195_p7), %s577_s7, 63 }
  0x29   : > { %s671_s28 = smul.u32 (!%p195_p7), 160, %s201_s27 }
  0x2b   : > { %s824_s29 = scalar_lea.vmem (!%p195_p7), [#allocation2], %s671_s28 }
  0x2d   : > { %v722_v20 = vmov 0   ;;  %v249_v21 = vld [vmem:[%s824_s29 + $0x80] sm:$0xff]  ;;  %v250_v22 = vld [vmem:[%s824_s29 + $0x88] sm:$0xff]  ;;  %vm363_vm0 = vcmask 1043456   ;;  %v252_v48 = vld [vmem:[%s824_s29 + $0x98] sm:$0xff]  ;;  %vm359_vm1 = vcmask 326656  }
  0x2e   : > { %697 = vset.pattern.permute.xlu0 %v722_v20  ;;  %v311_v23 = vunpack.c.l.b16 %v249_v21  ;;  %v312_v24 = vunpack.c.h.b16 %v249_v21  ;;  %v313_v25 = vunpack.c.l.b16 %v250_v22  ;;  %v314_v26 = vunpack.c.h.b16 %v250_v22  ;;  %v613_v27 = vld [vmem:[%s824_s29 + $0x40] sm:$0xf]  ;;  %v662_v33 = vld [vmem:[%s824_s29 + $0x44] sm:$0xf]  ;;  %v621_v35 = vld [vmem:[%s824_s29 + $0x48] sm:$0xf] }
  0x2f   : > { %v666_v28 = vld [vmem:[%s824_s29 + $0x5c] sm:$0xf0]  ;;  %v615_v34 = vld [vmem:[%s824_s29 + $0x60] sm:$0xf0]  ;;  %v667_v36 = vld [vmem:[%s824_s29 + $0x64] sm:$0xf0]  ;;  %v317_v53 = vunpack.c.l.b16 %v252_v48  ;;  %v318_v54 = vunpack.c.h.b16 %v252_v48 }
  0x30   : > { %v335_v29 = vpack.c.b16 %v311_v23, %v311_v23  ;;  %v336_v30 = vpack.c.b16 %v312_v24, %v312_v24  ;;  %v337_v31 = vpack.c.b16 %v313_v25, %v313_v25  ;;  %v338_v32 = vpack.c.b16 %v314_v26, %v314_v26  ;;  %v663_v37 = vld [vmem:[%s824_s29 + $0x4c] sm:$0xf]  ;;  %v581_v43 = vld [vmem:[%s824_s29] sm:$0xf]  ;;  %v654_v47 = vld [vmem:[%s824_s29 + $0x4] sm:$0xf] }
  0x31   : > { %v623_v38 = vld [vmem:[%s824_s29 + $0x68] sm:$0xf0]  ;;  %v614_v44 = vor.u32 %v666_v28, %v613_v27  ;;  %v618_v45 = vor.u32 %v662_v33, %v615_v34  ;;  %v658_v46 = vld [vmem:[%s824_s29 + $0x1c] sm:$0xf0]  ;;  %v622_v49 = vor.u32 %v667_v36, %v621_v35  ;;  %v583_v51 = vld [vmem:[%s824_s29 + $0x20] sm:$0xf0]  ;;  %v341_v61 = vpack.c.b16 %v317_v53, %v317_v53 }
  0x32   : > { %v365_v39 = vsel %vm363_vm0, %v335_v29, 0  ;;  %v368_v40 = vsel %vm363_vm0, %v336_v30, 0  ;;  %v371_v41 = vsel %vm363_vm0, %v337_v31, 0  ;;  %v374_v42 = vsel %vm363_vm0, %v338_v32, 0  ;;  %v589_v52 = vld [vmem:[%s824_s29 + $0x8] sm:$0xf] }
  0x33   : > { %393 = vmatpush.bf16.msra.mxu0 %v365_v39  ;;  %406 = vmatpush.bf16.msra.mxu1 %v368_v40  ;;  %v626_v50 = vor.u32 %v663_v37, %v623_v38  ;;  %v251_v55 = vld [vmem:[%s824_s29 + $0x90] sm:$0xff]  ;;  %v659_v56 = vld [vmem:[%s824_s29 + $0x24] sm:$0xf0]  ;;  %v655_v57 = vld [vmem:[%s824_s29 + $0xc] sm:$0xf]  ;;  %v342_v62 = vpack.c.b16 %v318_v54, %v318_v54  ;;  %v582_v63 = vor.u32 %v658_v46, %v581_v43  ;;  %v383_v7 = vsel %vm363_vm0, %v341_v61, 0 }
  0x34   : > { %419 = vmatpush.bf16.msra.mxu2 %v371_v41  ;;  %432 = vmatpush.bf16.msra.mxu3 %v374_v42  ;;  %v591_v58 = vld [vmem:[%s824_s29 + $0x28] sm:$0xf0]  ;;  %v315_v59 = vunpack.c.l.b16 %v251_v55  ;;  %v316_v60 = vunpack.c.h.b16 %v251_v55  ;;  %v586_v0 = vor.u32 %v654_v47, %v583_v51  ;;  %v590_v1 = vor.u32 %v659_v56, %v589_v52  ;;  %v637_v5 = vld [vmem:[%s824_s29 + $0x58] sm:$0xf]  ;;  %v665_v9 = vld [vmem:[%s824_s29 + $0x5c] sm:$0xf] }
  0x35   : > { %v594_v2 = vor.u32 %v655_v57, %v591_v58  ;;  %v669_v6 = vld [vmem:[%s824_s29 + $0x74] sm:$0xf0]  ;;  %v386_v8 = vsel %vm363_vm0, %v342_v62, 0  ;;  %v639_v10 = vld [vmem:[%s824_s29 + $0x78] sm:$0xf0]  ;;  %v253_v24 = vld [vmem:[%s907_s2] sm:$0xff] }
  0x36   : > { %v339_v3 = vpack.c.b16 %v315_v59, %v315_v59  ;;  %v340_v4 = vpack.c.b16 %v316_v60, %v316_v60  ;;  %v232_v11 = vld [vmem:[%s905_s0] sm:$0xf]  ;;  %v629_v12 = vld [vmem:[%s824_s29 + $0x50] sm:$0xf]  ;;  %v664_v14 = vld [vmem:[%s824_s29 + $0x54] sm:$0xf]  ;;  %v638_v17 = vor.u32 %v669_v6, %v637_v5  ;;  %v642_v18 = vor.u32 %v665_v9, %v639_v10  ;;  %256 = vperm.xlu0 %697, %v253_v24  }
  0x37   : > { %394 = vmatpush.bf16.msra.mxu0 %v614_v44  ;;  %407 = vmatpush.bf16.msra.mxu1 %v618_v45  ;;  %v668_v13 = vld [vmem:[%s824_s29 + $0x6c] sm:$0xf0]  ;;  %v631_v19 = vld [vmem:[%s824_s29 + $0x70] sm:$0xf0]  ;;  %v605_v20 = vld [vmem:[%s824_s29 + $0x18] sm:$0xf] }
  0x38   : > { %420 = vmatpush.bf16.msra.mxu2 %v622_v49  ;;  %433 = vmatpush.bf16.msra.mxu3 %v626_v50  ;;  %v377_v15 = vsel %vm363_vm0, %v339_v3, 0  ;;  %v380_v16 = vsel %vm363_vm0, %v340_v4, 0  ;;  %v661_v21 = vld [vmem:[%s824_s29 + $0x34] sm:$0xf0]  ;;  %v657_v22 = vld [vmem:[%s824_s29 + $0x1c] sm:$0xf]  ;;  %v630_v25 = vor.u32 %v668_v13, %v629_v12  ;;  %v634_v26 = vor.u32 %v664_v14, %v631_v19 }
  0x39   : > { %v607_v23 = vld [vmem:[%s824_s29 + $0x38] sm:$0xf0]  ;;  %v597_v27 = vld [vmem:[%s824_s29 + $0x10] sm:$0xf]  ;;  %v606_v28 = vor.u32 %v661_v21, %v605_v20  ;;  %v656_v31 = vld [vmem:[%s824_s29 + $0x14] sm:$0xf] }
  0x3a   : > { %v610_v29 = vor.u32 %v657_v22, %v607_v23  ;;  %v660_v30 = vld [vmem:[%s824_s29 + $0x2c] sm:$0xf0]  ;;  %v599_v32 = vld [vmem:[%s824_s29 + $0x30] sm:$0xf0]  ;;  %s913_s7 = smov (!%p226_p8, %s577_s7), 63 }
  0x3b   : > { %395 = vmatpush.bf16.msra.mxu0 %v582_v63  ;;  %408 = vmatpush.bf16.msra.mxu1 %v586_v0  ;;  %v598_v33 = vor.u32 %v660_v30, %v597_v27  ;;  %v602_v34 = vor.u32 %v656_v31, %v599_v32  ;;  %s578_s8 = sshll.u32 %s913_s7, 2 }
  0x3c   : > { %421 = vmatpush.bf16.msra.mxu2 %v590_v1  ;;  %434 = vmatpush.bf16.msra.mxu3 %v594_v2  ;;  %s889_s11 = scalar_lea.vmem %s908_s3, %s578_s8 }
  0x3e   : > { %643 = vmatmul.msk.bf16.vlgmr.msra.gmra.mxu0 %vm359_vm1, %v232_v11  ;;  %644 = vmatmul.msk.bf16.vlgmr.msra.gmra.mxu1 %vm359_vm1, %v232_v11 }
  0x3f   : > { %645 = vmatmul.msk.bf16.vlgmr.msra.gmra.mxu2 %vm359_vm1, %v232_v11  ;;  %646 = vmatmul.msk.bf16.vlgmr.msra.gmra.mxu3 %vm359_vm1, %v232_v11 }
  0x40   : > { %471 = vmatpush.bf16.msrb.mxu2 %v383_v7  ;;  %484 = vmatpush.bf16.msrb.mxu3 %v386_v8 }
  0x41   : > { %445 = vmatpush.bf16.msrb.mxu0 %v377_v15  ;;  %458 = vmatpush.bf16.msrb.mxu1 %v380_v16 }
  0x44   : > { %472 = vmatpush.bf16.msrb.mxu2 %v638_v17  ;;  %485 = vmatpush.bf16.msrb.mxu3 %v642_v18 }
  0x45   : > { %446 = vmatpush.bf16.msrb.mxu0 %v630_v25  ;;  %459 = vmatpush.bf16.msrb.mxu1 %v634_v26 }
  0x48   : > { %473 = vmatpush.bf16.msrb.mxu2 %v606_v28  ;;  %486 = vmatpush.bf16.msrb.mxu3 %v610_v29 }
  0x49   : > { %447 = vmatpush.bf16.msrb.mxu0 %v598_v33  ;;  %460 = vmatpush.bf16.msrb.mxu1 %v602_v34 }
  0x4e   : > { %647 = vmatmul.msk.bf16.vlgmr.msrb.gmra.mxu0 %vm359_vm1, %v232_v11  ;;  %648 = vmatmul.msk.bf16.vlgmr.msrb.gmra.mxu1 %vm359_vm1, %v232_v11 }
  0x4f   : > { %649 = vmatmul.msk.bf16.vlgmr.msrb.gmra.mxu2 %vm359_vm1, %v232_v11  ;;  %650 = vmatmul.msk.bf16.vlgmr.msrb.gmra.mxu3 %vm359_vm1, %v232_v11 }
  0xa8   : > { %v257_v35 = vpop.permute.xlu0 %256 }
  0xbb   : > { %v397_v36 = vpop.f32.mrf.mxu0  ;;  %v410_v37 = vpop.f32.mrf.mxu1 }
  0xbc   : > { %v398_v38 = vadd.f32 %v397_v36, %v257_v35  ;;  %v411_v39 = vadd.f32 %v410_v37, %v257_v35 }
  0xbe   : > { %v492_v40 = vmax.f32 %v398_v38, 0.0  ;;  %v493_v41 = vmax.f32 %v411_v39, 0.0 }
  0xc0   : > { %v500_v42 = vpack.c.bf16 %v493_v41, %v492_v40 }
  0xc2   : > { %v423_v43 = vpop.f32.mrf.mxu2  ;;  %v436_v44 = vpop.f32.mrf.mxu3  ;;  %504 = vst [vmem:[%s889_s11] sm:$0xff] %v500_v42 }
  0xc3   : > { %v424_v45 = vadd.f32 %v423_v43, %v257_v35  ;;  %v437_v46 = vadd.f32 %v436_v44, %v257_v35  ;;  %v399_v47 = vpop.f32.mrf.mxu0  ;;  %v412_v48 = vpop.f32.mrf.mxu1 }
  0xc5   : > { %v494_v49 = vmax.f32 %v424_v45, 0.0  ;;  %v495_v50 = vmax.f32 %v437_v46, 0.0 }
  0xc7   : > { %v501_v51 = vpack.c.bf16 %v495_v50, %v494_v49 }
  0xc9   : > { %505 = vst [vmem:[%s889_s11 + $0x8] sm:$0xff] %v501_v51 }
  0xca   : > { %v425_v52 = vpop.f32.mrf.mxu2  ;;  %v438_v53 = vpop.f32.mrf.mxu3 }
  0xcb   : > { %v449_v54 = vpop.f32.mrf.mxu0  ;;  %v462_v55 = vpop.f32.mrf.mxu1 }
  0xcc   : > { %v450_v56 = vadd.f32 %v449_v54, %v257_v35  ;;  %v463_v57 = vadd.f32 %v462_v55, %v257_v35 }
  0xce   : > { %v496_v58 = vmax.f32 %v450_v56, 0.0  ;;  %v497_v59 = vmax.f32 %v463_v57, 0.0 }
  0xd0   : > { %v502_v60 = vpack.c.bf16 %v497_v59, %v496_v58 }
  0xd2   : > { %506 = vst [vmem:[%s889_s11 + $0x10] sm:$0xff] %v502_v60  ;;  %v475_v61 = vpop.f32.mrf.mxu2  ;;  %v488_v62 = vpop.f32.mrf.mxu3 }
  0xd3   : > { %v476_v63 = vadd.f32 %v475_v61, %v257_v35  ;;  %v489_v0 = vadd.f32 %v488_v62, %v257_v35  ;;  %v451_v1 = vpop.f32.mrf.mxu0  ;;  %v464_v2 = vpop.f32.mrf.mxu1 }
  0xd5   : > { %v498_v3 = vmax.f32 %v476_v63, 0.0  ;;  %v499_v4 = vmax.f32 %v489_v0, 0.0 }
  0xd7   : > { %v503_v5 = vpack.c.bf16 %v499_v4, %v498_v3 }
  0xd9   : > { %507 = vst [vmem:[%s889_s11 + $0x18] sm:$0xff] %v503_v5 }
  0xda   : > { %v477_v6 = vpop.f32.mrf.mxu2  ;;  %v490_v7 = vpop.f32.mrf.mxu3 }
  0xdb PF: > { %p10_p9 = scmp.ge.s32.totalorder %s760_s16, 10   ;;  %s909_s12 = smov %s716_s13 }
  0xdc   : > { %s910_s13 = smov %s769_s19  ;;  %s911_s14 = smov %s760_s16 }
  0xdd   :  { %12 = sbr.rel (!%p10_p9) target bundleno = 2 (0x2), region = 90 }

// kernel: decoder_unet_forward.19
= control target key start
LH: loop header
LB: loop body
LE: loop exit
PB: predicated region body
PF: predicated region fallthrough
CT: control target
= control target key end

     0   :  { %s461_s12 = smov 0   ;;  %s504_s0 = inlined_call_operand.vmem [shape: bf16[8,8], index: 0, kind: input, shape index: {}]   ;;  %s505_s1 = inlined_call_operand.vmem [shape: bf16[8,8192], index: 1, kind: input, shape index: {}]   ;;  %s506_s2 = inlined_call_operand.vmem [shape: f32[8,1], index: 2, kind: input, shape index: {}]   ;;  %s507_s3 = inlined_call_operand.vmem [shape: f32[8,8192], index: 3, kind: output, shape index: {}]  }
   0x1 LB: > { %s403_s13 = sadd.s32 4294967295, %s438_s12   ;;  %p407_p0 = scmp.ge.s32.totalorder %s438_s12, 1  ;;  %s438_s12 = sphi %s461_s12, %s13_s12  }
   0x2   : > { %p138_p1 = scmp.lt.s32.totalorder %s438_s12, 9 }
   0x4   : > { %p139_p2 = pnand %p407_p0, %p138_p1 }
   0x5   : > { %s408_s14 = sshll.u32 (!%p139_p2), %s403_s13, 3 }
   0x6   : > { %142 = sbr.rel (%p139_p2) target bundleno = 180 (0xb4), region = 32  ;;  %p163_p3 = scmp.lt.s32.totalorder (!%p139_p2), %s408_s14, 63 }
   0xb   : > { %v440_v0 = vmov 0   ;;  %v180_v1 = vld [vmem:[%s506_s2] sm:$0xff]  ;;  %s509_s14 = smov (!%p163_p3, %s408_s14), 63  ;;  %vm210_vm0 = vcmask 1043456   ;;  %vm206_vm1 = vcmask 64512  }
   0xc   : > { %431 = vset.pattern.permute.xlu0 %v440_v0  ;;  %s409_s17 = sshll.u32 %s509_s14, 2  ;;  %v175_v26 = vld [vmem:[%s504_s0] sm:$0xf]  ;;  %s411_s23 = sshll.u32 %s509_s14, 3 }
   0xd   : > { %183 = vperm.xlu0 %431, %v180_v1   ;;  %s166_s20 = scalar_lea.vmem %s505_s1, %s409_s17  ;;  %s172_s26 = scalar_lea.vmem %s507_s3, %s411_s23 }
   0xe   : > { %v176_v2 = vld [vmem:[%s166_s20] sm:$0xff]  ;;  %v177_v3 = vld [vmem:[%s166_s20 + $0x8] sm:$0xff]  ;;  %v179_v4 = vld [vmem:[%s166_s20 + $0x18] sm:$0xff] }
   0xf   : > { %v190_v5 = vunpack.c.l.b16 %v176_v2  ;;  %v191_v6 = vunpack.c.h.b16 %v176_v2  ;;  %v192_v7 = vunpack.c.l.b16 %v177_v3  ;;  %v193_v8 = vunpack.c.h.b16 %v177_v3  ;;  %v178_v9 = vld [vmem:[%s166_s20 + $0x10] sm:$0xff] }
  0x10   : > { %v196_v10 = vunpack.c.l.b16 %v179_v4  ;;  %v197_v11 = vunpack.c.h.b16 %v179_v4  ;;  %v194_v12 = vunpack.c.l.b16 %v178_v9  ;;  %v195_v13 = vunpack.c.h.b16 %v178_v9 }
  0x11   : > { %v198_v14 = vpack.c.b16 %v190_v5, %v190_v5  ;;  %v199_v15 = vpack.c.b16 %v191_v6, %v191_v6  ;;  %v200_v16 = vpack.c.b16 %v192_v7, %v192_v7  ;;  %v201_v17 = vpack.c.b16 %v193_v8, %v193_v8 }
  0x12   : > { %v204_v18 = vpack.c.b16 %v196_v10, %v196_v10  ;;  %v205_v19 = vpack.c.b16 %v197_v11, %v197_v11  ;;  %v202_v20 = vpack.c.b16 %v194_v12, %v194_v12  ;;  %v203_v21 = vpack.c.b16 %v195_v13, %v195_v13 }
  0x13   : > { %v212_v22 = vsel %vm210_vm0, %v198_v14, 0  ;;  %v215_v23 = vsel %vm210_vm0, %v199_v15, 0  ;;  %v218_v24 = vsel %vm210_vm0, %v200_v16, 0  ;;  %v221_v25 = vsel %vm210_vm0, %v201_v17, 0 }
  0x14   : > { %242 = vmatpush.bf16.msra.mxu0 %v212_v22  ;;  %255 = vmatpush.bf16.msra.mxu1 %v215_v23  ;;  %v230_v27 = vsel %vm210_vm0, %v204_v18, 0  ;;  %v233_v28 = vsel %vm210_vm0, %v205_v19, 0  ;;  %v224_v29 = vsel %vm210_vm0, %v202_v20, 0  ;;  %v227_v30 = vsel %vm210_vm0, %v203_v21, 0 }
  0x15   : > { %268 = vmatpush.bf16.msra.mxu2 %v218_v24  ;;  %281 = vmatpush.bf16.msra.mxu3 %v221_v25 }
  0x17   : > { %412 = vmatmul.msk.bf16.vlgmr.msra.gmra.mxu0 %vm206_vm1, %v175_v26  ;;  %413 = vmatmul.msk.bf16.vlgmr.msra.gmra.mxu1 %vm206_vm1, %v175_v26 }
  0x18   : > { %414 = vmatmul.msk.bf16.vlgmr.msra.gmra.mxu2 %vm206_vm1, %v175_v26  ;;  %415 = vmatmul.msk.bf16.vlgmr.msra.gmra.mxu3 %vm206_vm1, %v175_v26 }
  0x19   : > { %320 = vmatpush.bf16.msrb.mxu2 %v230_v27  ;;  %333 = vmatpush.bf16.msrb.mxu3 %v233_v28 }
  0x1a   : > { %294 = vmatpush.bf16.msrb.mxu0 %v224_v29  ;;  %307 = vmatpush.bf16.msrb.mxu1 %v227_v30 }
  0x27   : > { %416 = vmatmul.msk.bf16.vlgmr.msrb.gmra.mxu0 %vm206_vm1, %v175_v26  ;;  %417 = vmatmul.msk.bf16.vlgmr.msrb.gmra.mxu1 %vm206_vm1, %v175_v26 }
  0x28   : > { %418 = vmatmul.msk.bf16.vlgmr.msrb.gmra.mxu2 %vm206_vm1, %v175_v26  ;;  %419 = vmatmul.msk.bf16.vlgmr.msrb.gmra.mxu3 %vm206_vm1, %v175_v26 }
  0x7f   : > { %v184_v31 = vpop.permute.xlu0 %183 }
  0x94   : > { %v244_v32 = vpop.f32.mrf.mxu0  ;;  %v257_v33 = vpop.f32.mrf.mxu1 }
  0x95   : > { %v245_v34 = vadd.f32 %v244_v32, %v184_v31  ;;  %v258_v35 = vadd.f32 %v257_v33, %v184_v31 }
  0x97   : > { %339 = vst [vmem:[%s172_s26] sm:$0xff] %v245_v34 }
  0x98   : > { %340 = vst [vmem:[%s172_s26 + $0x8] sm:$0xff] %v258_v35 }
  0x9b   : > { %v270_v36 = vpop.f32.mrf.mxu2  ;;  %v283_v37 = vpop.f32.mrf.mxu3 }
  0x9c   : > { %v271_v38 = vadd.f32 %v270_v36, %v184_v31  ;;  %v284_v39 = vadd.f32 %v283_v37, %v184_v31  ;;  %v246_v40 = vpop.f32.mrf.mxu0  ;;  %v259_v41 = vpop.f32.mrf.mxu1 }
  0x9e   : > { %341 = vst [vmem:[%s172_s26 + $0x10] sm:$0xff] %v271_v38 }
  0x9f   : > { %342 = vst [vmem:[%s172_s26 + $0x18] sm:$0xff] %v284_v39 }
  0xa3   : > { %v272_v42 = vpop.f32.mrf.mxu2  ;;  %v285_v43 = vpop.f32.mrf.mxu3 }
  0xa4   : > { %v296_v44 = vpop.f32.mrf.mxu0  ;;  %v309_v45 = vpop.f32.mrf.mxu1 }
  0xa5   : > { %v297_v46 = vadd.f32 %v296_v44, %v184_v31  ;;  %v310_v47 = vadd.f32 %v309_v45, %v184_v31 }
  0xa7   : > { %343 = vst [vmem:[%s172_s26 + $0x20] sm:$0xff] %v297_v46 }
  0xa8   : > { %344 = vst [vmem:[%s172_s26 + $0x28] sm:$0xff] %v310_v47 }
  0xab   : > { %v322_v48 = vpop.f32.mrf.mxu2  ;;  %v335_v49 = vpop.f32.mrf.mxu3 }
  0xac   : > { %v323_v50 = vadd.f32 %v322_v48, %v184_v31  ;;  %v336_v51 = vadd.f32 %v335_v49, %v184_v31  ;;  %v298_v52 = vpop.f32.mrf.mxu0  ;;  %v311_v53 = vpop.f32.mrf.mxu1 }
  0xae   : > { %345 = vst [vmem:[%s172_s26 + $0x30] sm:$0xff] %v323_v50 }
  0xaf   : > { %346 = vst [vmem:[%s172_s26 + $0x38] sm:$0xff] %v336_v51 }
  0xb3   : > { %v324_v54 = vpop.f32.mrf.mxu2  ;;  %v337_v55 = vpop.f32.mrf.mxu3 }
  0xb4 PF: > { %s13_s12 = sadd.s32 1, %s438_s12  }
  0xb5   : > { %p10_p4 = scmp.ge.s32.totalorder %s13_s12, 10  }
  0xb7   :  { %12 = sbr.rel (!%p10_p4) target bundleno = 1 (0x1), region = 62 }

</bundles_post_ra>
